<compile_context>
chip_gen: v7x
topology: tpu7x:2x2x1
jax: 0.10.0
libtpu: 0.0.40
codegen_flags: <defaults>
</compile_context>

<pallas_src>
import jax
import jax.numpy as jnp
from jax.experimental import pallas as pl
from jax.experimental.pallas import tpu as pltpu


def mlp_kernel(x_ref, w1_ref, b1_ref, w2_ref, b2_ref, w3_ref, b3_ref, o_ref):
    # Layer 1: bf16 x bf16 on the MXU with f32 accumulation.  x (tiny) is cast
    # in-kernel; W1 arrives pre-cast to bf16 from HBM (the dominant transfer).
    h1 = jnp.dot(x_ref[...].astype(jnp.bfloat16), w1_ref[...],
                 preferred_element_type=jnp.float32)
    h1 = jnp.maximum(h1 + b1_ref[...], 0.0)                       # (B, 100)

    # Layer 2 + ReLU (tiny, f32).
    h2 = jnp.dot(h1, w2_ref[...], preferred_element_type=jnp.float32)
    h2 = jnp.maximum(h2 + b2_ref[...], 0.0)                       # (B, 10)

    # Layer 3 (tiny, f32).
    out = jnp.dot(h2, w3_ref[...], preferred_element_type=jnp.float32)
    o_ref[...] = (out + b3_ref[...]).astype(o_ref.dtype)          # (B, 2)


def prepare_params(params):
    """One-time (model-load) conversion: W1 stored in HBM as bfloat16.

    Everything else stays f32; no padding is needed (full-array blocks are
    exempt from the (8,128) divisibility rule)."""
    w1, b1, w2, b2, w3, b3 = params
    return (w1.astype(jnp.bfloat16), b1, w2, b2, w3, b3)


def logistic_regression_forward(x, prepared_params):
    """Forward pass.  `prepared_params` must come from `prepare_params`."""
    w1, b1, w2, b2, w3, b3 = prepared_params
    B = x.shape[0]
    n_out = w3.shape[1]

    def full_spec(a):
        nd = a.ndim
        # Full-array block, constant block index: fetched once into VMEM.
        return pl.BlockSpec(a.shape, lambda i, _nd=nd: (0,) * _nd)

    operands = (x, w1, b1, w2, b2, w3, b3)

    return pl.pallas_call(
        mlp_kernel,
        out_shape=jax.ShapeDtypeStruct((B, n_out), jnp.float32),
        grid=(1,),  # single step: full-K reduction, no pipeline overhead
        in_specs=[full_spec(a) for a in operands],
        out_specs=pl.BlockSpec((B, n_out), lambda i: (0, 0)),
        compiler_params=pltpu.CompilerParams(
            dimension_semantics=("arbitrary",),
            vmem_limit_bytes=32 << 20,   # working set ~2 MB; stay conservative
        ),
    )(*operands)


def init_params(key):
    """Deterministic init mirroring nn.Linear's default U(-1/sqrt(fan_in), ...)."""
    def linear(k, fan_in, fan_out):
        kw, kb = jax.random.split(k)
        bound = 1.0 / (fan_in ** 0.5)
        w = jax.random.uniform(kw, (fan_in, fan_out), jnp.float32, -bound, bound)
        b = jax.random.uniform(kb, (1, fan_out), jnp.float32, -bound, bound)
        return w, b

    k1, k2, k3 = jax.random.split(key, 3)
    w1, b1 = linear(k1, 10000, 100)
    w2, b2 = linear(k2, 100, 10)
    w3, b3 = linear(k3, 10, 2)
    return (w1, b1, w2, b2, w3, b3)


def reference_forward(x, params):
    """Pure-JAX reference using the same bf16 rounding of x/W1 as the kernel."""
    w1, b1, w2, b2, w3, b3 = params
    x16 = x.astype(jnp.bfloat16).astype(jnp.float32)
    w116 = w1.astype(jnp.bfloat16).astype(jnp.float32)
    h1 = jnp.maximum(x16 @ w116 + b1, 0.0)
    h2 = jnp.maximum(h1 @ w2 + b2, 0.0)
    return h2 @ w3 + b3


def reference_forward_f32(x, params):
    w1, b1, w2, b2, w3, b3 = params
    h1 = jnp.maximum(x @ w1 + b1, 0.0)
    h2 = jnp.maximum(h1 @ w2 + b2, 0.0)
    return h2 @ w3 + b3


if __name__ == "__main__":
    key = jax.random.PRNGKey(0)
    kx, kp = jax.random.split(key)

    batch = 2
    x = jax.random.normal(kx, (batch, 10000), dtype=jnp.float32)
    params = init_params(kp)

    # One-time weight preparation (outside the per-call forward path).
    prepared = prepare_params(params)
    prepared = jax.block_until_ready(prepared)

    fwd = jax.jit(logistic_regression_forward)
    out = jax.block_until_ready(fwd(x, prepared))

    assert out.shape == (batch, 2), out.shape

    # Tight check vs. a reference that applies the same bf16 rounding to x/W1.
    ref = reference_forward(x, params)
    assert jnp.allclose(out, ref, atol=1e-3, rtol=1e-3), (out, ref)

    # Loose sanity check vs. the full-f32 PyTorch-equivalent math
    # (bf16 first-layer weights change numerics slightly).
    ref32 = reference_forward_f32(x, params)
    assert jnp.allclose(out, ref32, atol=5e-2, rtol=5e-2), (out, ref32)

    print("KERNEL_OK")
</pallas_src>

<mosaic_0001>
module attributes {stable_mosaic.version = 11 : i64} {
  func.func @mlp_kernel(%arg0: i32, %arg1: memref<2x10000xf32, #tpu.memory_space<vmem>>, %arg2: memref<10000x100xbf16, #tpu.memory_space<vmem>>, %arg3: memref<1x100xf32, #tpu.memory_space<vmem>>, %arg4: memref<100x10xf32, #tpu.memory_space<vmem>>, %arg5: memref<1x10xf32, #tpu.memory_space<vmem>>, %arg6: memref<10x2xf32, #tpu.memory_space<vmem>>, %arg7: memref<1x2xf32, #tpu.memory_space<vmem>>, %arg8: memref<2x2xf32, #tpu.memory_space<vmem>>) attributes {dimension_semantics = [#tpu.dimension_semantics<arbitrary>], iteration_bounds = array<i64: 1>, scalar_prefetch = 0 : i64, scratch_operands = 0 : i64, tpu.core_type = #tpu.core_type<tc>, window_params = [{pipeline_mode = #tpu.pipeline_mode<synchronous>, transform_indices = @transform_0, window_bounds = array<i64: 2, 10000>}, {pipeline_mode = #tpu.pipeline_mode<synchronous>, transform_indices = @transform_1, window_bounds = array<i64: 10000, 100>}, {pipeline_mode = #tpu.pipeline_mode<synchronous>, transform_indices = @transform_2, window_bounds = array<i64: 1, 100>}, {pipeline_mode = #tpu.pipeline_mode<synchronous>, transform_indices = @transform_3, window_bounds = array<i64: 100, 10>}, {pipeline_mode = #tpu.pipeline_mode<synchronous>, transform_indices = @transform_4, window_bounds = array<i64: 1, 10>}, {pipeline_mode = #tpu.pipeline_mode<synchronous>, transform_indices = @transform_5, window_bounds = array<i64: 10, 2>}, {pipeline_mode = #tpu.pipeline_mode<synchronous>, transform_indices = @transform_6, window_bounds = array<i64: 1, 2>}, {pipeline_mode = #tpu.pipeline_mode<synchronous>, transform_indices = @transform_7, window_bounds = array<i64: 2, 2>}]} {
    %c0 = arith.constant 0 : index
    %c0_0 = arith.constant 0 : index
    %0 = vector.load %arg1[%c0, %c0_0] : memref<2x10000xf32, #tpu.memory_space<vmem>>, vector<2x10000xf32>
    %1 = arith.truncf %0 : vector<2x10000xf32> to vector<2x10000xbf16>
    %c0_1 = arith.constant 0 : index
    %c0_2 = arith.constant 0 : index
    %2 = vector.load %arg2[%c0_1, %c0_2] : memref<10000x100xbf16, #tpu.memory_space<vmem>>, vector<10000x100xbf16>
    %cst = arith.constant dense<0.000000e+00> : vector<2x100xf32>
    %3 = tpu.matmul %1, %2, %cst {dimension_numbers = #tpu.dot_dimension_numbers<[1], [0], [0], [1], [0, 0, 1, 1], [], []>} : vector<2x10000xbf16>, vector<10000x100xbf16>, vector<2x100xf32> -> vector<2x100xf32>
    %c0_3 = arith.constant 0 : index
    %c0_4 = arith.constant 0 : index
    %4 = vector.load %arg3[%c0_3, %c0_4] : memref<1x100xf32, #tpu.memory_space<vmem>>, vector<1x100xf32>
    %5 = vector.broadcast %4 : vector<1x100xf32> to vector<2x100xf32>
    %6 = arith.addf %3, %5 : vector<2x100xf32>
    %cst_5 = arith.constant 0.000000e+00 : f32
    %7 = vector.broadcast %cst_5 : f32 to vector<2x100xf32>
    %8 = arith.maximumf %6, %7 : vector<2x100xf32>
    %c0_6 = arith.constant 0 : index
    %c0_7 = arith.constant 0 : index
    %9 = vector.load %arg4[%c0_6, %c0_7] : memref<100x10xf32, #tpu.memory_space<vmem>>, vector<100x10xf32>
    %cst_8 = arith.constant dense<0.000000e+00> : vector<2x10xf32>
    %10 = tpu.matmul %8, %9, %cst_8 {dimension_numbers = #tpu.dot_dimension_numbers<[1], [0], [0], [1], [0, 0, 1, 1], [], []>} : vector<2x100xf32>, vector<100x10xf32>, vector<2x10xf32> -> vector<2x10xf32>
    %c0_9 = arith.constant 0 : index
    %c0_10 = arith.constant 0 : index
    %11 = vector.load %arg5[%c0_9, %c0_10] : memref<1x10xf32, #tpu.memory_space<vmem>>, vector<1x10xf32>
    %12 = vector.broadcast %11 : vector<1x10xf32> to vector<2x10xf32>
    %13 = arith.addf %10, %12 : vector<2x10xf32>
    %cst_11 = arith.constant 0.000000e+00 : f32
    %14 = vector.broadcast %cst_11 : f32 to vector<2x10xf32>
    %15 = arith.maximumf %13, %14 : vector<2x10xf32>
    %c0_12 = arith.constant 0 : index
    %c0_13 = arith.constant 0 : index
    %16 = vector.load %arg6[%c0_12, %c0_13] : memref<10x2xf32, #tpu.memory_space<vmem>>, vector<10x2xf32>
    %cst_14 = arith.constant dense<0.000000e+00> : vector<2x2xf32>
    %17 = tpu.matmul %15, %16, %cst_14 {dimension_numbers = #tpu.dot_dimension_numbers<[1], [0], [0], [1], [0, 0, 1, 1], [], []>} : vector<2x10xf32>, vector<10x2xf32>, vector<2x2xf32> -> vector<2x2xf32>
    %c0_15 = arith.constant 0 : index
    %c0_16 = arith.constant 0 : index
    %18 = vector.load %arg7[%c0_15, %c0_16] : memref<1x2xf32, #tpu.memory_space<vmem>>, vector<1x2xf32>
    %19 = vector.broadcast %18 : vector<1x2xf32> to vector<2x2xf32>
    %20 = arith.addf %17, %19 : vector<2x2xf32>
    %c0_17 = arith.constant 0 : index
    %c0_18 = arith.constant 0 : index
    %21 = vector.load %arg8[%c0_17, %c0_18] : memref<2x2xf32, #tpu.memory_space<vmem>>, vector<2x2xf32>
    tpu.vector_store %arg8[%c0_17, %c0_18], %20 {strides = array<i32>} : memref<2x2xf32, #tpu.memory_space<vmem>>, vector<2x2xf32>,
    return
  }
  func.func @transform_0(%arg0: i32) -> (i32, i32) {
    %c0_i32 = arith.constant 0 : i32
    %c0_i32_0 = arith.constant 0 : i32
    %c0_i32_1 = arith.constant 0 : i32
    return %c0_i32, %c0_i32_0 : i32, i32
  }
  func.func @transform_1(%arg0: i32) -> (i32, i32) {
    %c0_i32 = arith.constant 0 : i32
    %c0_i32_0 = arith.constant 0 : i32
    %c0_i32_1 = arith.constant 0 : i32
    return %c0_i32, %c0_i32_0 : i32, i32
  }
  func.func @transform_2(%arg0: i32) -> (i32, i32) {
    %c0_i32 = arith.constant 0 : i32
    %c0_i32_0 = arith.constant 0 : i32
    %c0_i32_1 = arith.constant 0 : i32
    return %c0_i32, %c0_i32_0 : i32, i32
  }
  func.func @transform_3(%arg0: i32) -> (i32, i32) {
    %c0_i32 = arith.constant 0 : i32
    %c0_i32_0 = arith.constant 0 : i32
    %c0_i32_1 = arith.constant 0 : i32
    return %c0_i32, %c0_i32_0 : i32, i32
  }
  func.func @transform_4(%arg0: i32) -> (i32, i32) {
    %c0_i32 = arith.constant 0 : i32
    %c0_i32_0 = arith.constant 0 : i32
    %c0_i32_1 = arith.constant 0 : i32
    return %c0_i32, %c0_i32_0 : i32, i32
  }
  func.func @transform_5(%arg0: i32) -> (i32, i32) {
    %c0_i32 = arith.constant 0 : i32
    %c0_i32_0 = arith.constant 0 : i32
    %c0_i32_1 = arith.constant 0 : i32
    return %c0_i32, %c0_i32_0 : i32, i32
  }
  func.func @transform_6(%arg0: i32) -> (i32, i32) {
    %c0_i32 = arith.constant 0 : i32
    %c0_i32_0 = arith.constant 0 : i32
    %c0_i32_1 = arith.constant 0 : i32
    return %c0_i32, %c0_i32_0 : i32, i32
  }
  func.func @transform_7(%arg0: i32) -> (i32, i32) {
    %c0_i32 = arith.constant 0 : i32
    %c0_i32_0 = arith.constant 0 : i32
    %c0_i32_1 = arith.constant 0 : i32
    return %c0_i32, %c0_i32_0 : i32, i32
  }
}

</mosaic_0001>

<bundles_post_ra>
// kernel: logistic_regression_forward.1
= control target key start
LH: loop header
LB: loop body
LE: loop exit
PB: predicated region body
PF: predicated region fallthrough
CT: control target
= control target key end

     0   :  { %v72_v27 = vlaneseq  ;;  %v9628_v35 = vmov 1983009808   ;;  %vm9630_vm0 = vmmov 0   ;;  %s11761_s0 = inlined_call_operand.vmem [shape: f32[2,10000], index: 0, kind: input, shape index: {}]   ;;  %s11762_s1 = inlined_call_operand.vmem [shape: bf16[10000,100], index: 1, kind: input, shape index: {}]   ;;  %s11763_s2 = inlined_call_operand.vmem [shape: f32[1,100], index: 2, kind: input, shape index: {}]   ;;  %s11764_s3 = inlined_call_operand.vmem [shape: f32[100,10], index: 3, kind: input, shape index: {}]   ;;  %s11765_s4 = inlined_call_operand.vmem [shape: f32[1,10], index: 4, kind: input, shape index: {}]   ;;  %s11766_s5 = inlined_call_operand.vmem [shape: f32[10,2], index: 5, kind: input, shape index: {}]   ;;  %s11767_s6 = inlined_call_operand.vmem [shape: f32[1,2], index: 6, kind: input, shape index: {}]   ;;  %s11768_s7 = inlined_call_operand.hbm [shape: f32[2,2], index: 7, kind: output, shape index: {}]  }
   0x1   :  { %v8959_v0 = vld [vmem:[%s11762_s1 + $0x40] sm:$0xff]   ;;  %v8963_v4 = vld [vmem:[%s11762_s1 + $0x48] sm:$0xff]   ;;  %v8967_v8 = vld [vmem:[%s11762_s1 + $0x50] sm:$0xff]   ;;  %v70_v36 = vunpack.c.l.s4 %v9628_v35 }
   0x2   :  { %v8960_v1 = vld [vmem:[%s11762_s1] sm:$0xff]   ;;  %8012 = vmatprep.subr.bf16.mxu0 %v8959_v0  ;;  %v8964_v5 = vld [vmem:[%s11762_s1 + $0x8] sm:$0xff]   ;;  %v8968_v9 = vld [vmem:[%s11762_s1 + $0x10] sm:$0xff]   ;;  %v73_v32 = vshrl.u32 %v72_v27, 7 }
   0x3   :  { %v8961_v2 = vld [vmem:[%s11762_s1 + $0xc0] sm:$0xff]   ;;  %8013 = vmatpush3.bf16.msra.mxu0 %v8960_v1  ;;  %v8965_v6 = vld [vmem:[%s11762_s1 + $0xc8] sm:$0xff]   ;;  %v8969_v10 = vld [vmem:[%s11762_s1 + $0xd0] sm:$0xff]   ;;  %v71_v38 = vunpack.c.0.s8 %v70_v36 }
   0x4   :  { %v8962_v3 = vld [vmem:[%s11762_s1 + $0x80] sm:$0xff]   ;;  %8034 = vmatprep.subr.bf16.mxu1 %v8961_v2  ;;  %8014 = vmatprep.subr.bf16.mxu0 %v8963_v4  ;;  %v8966_v7 = vld [vmem:[%s11762_s1 + $0x88] sm:$0xff]   ;;  %v8970_v11 = vld [vmem:[%s11762_s1 + $0x90] sm:$0xff]  }
   0x5   :  { %8035 = vmatpush3.bf16.msra.mxu1 %v8962_v3  ;;  %v8971_v12 = vld [vmem:[%s11762_s1 + $0x58] sm:$0xff]   ;;  %v8975_v16 = vld [vmem:[%s11762_s1 + $0x60] sm:$0xff]   ;;  %v8979_v20 = vld [vmem:[%s11762_s1 + $0x68] sm:$0xff]   ;;  %v9779_v41 = vsub.s32 %v71_v38, %v73_v32 }
   0x6   :  { %8036 = vmatprep.subr.bf16.mxu1 %v8965_v6  ;;  %v8972_v13 = vld [vmem:[%s11762_s1 + $0x18] sm:$0xff]   ;;  %v8976_v17 = vld [vmem:[%s11762_s1 + $0x20] sm:$0xff]   ;;  %v8980_v21 = vld [vmem:[%s11762_s1 + $0x28] sm:$0xff]  }
   0x7   :  { %8015 = vmatpush3.bf16.msra.mxu0 %v8964_v5  ;;  %v8973_v14 = vld [vmem:[%s11762_s1 + $0xd8] sm:$0xff]   ;;  %v8977_v18 = vld [vmem:[%s11762_s1 + $0xe0] sm:$0xff]   ;;  %v8981_v22 = vld [vmem:[%s11762_s1 + $0xe8] sm:$0xff]  }
   0x8   :  { %8016 = vmatprep.subr.bf16.mxu0 %v8967_v8  ;;  %v8974_v15 = vld [vmem:[%s11762_s1 + $0x98] sm:$0xff]   ;;  %v8978_v19 = vld [vmem:[%s11762_s1 + $0xa0] sm:$0xff]   ;;  %v8982_v23 = vld [vmem:[%s11762_s1 + $0xa8] sm:$0xff]  }
   0x9   :  { %8037 = vmatpush3.bf16.msra.mxu1 %v8966_v7  ;;  %v8983_v24 = vld [vmem:[%s11762_s1 + $0x70] sm:$0xff]   ;;  %v8987_v29 = vld [vmem:[%s11762_s1 + $0x78] sm:$0xff]   ;;  %v28_v33 = vld [vmem:[%s11761_s0] sm:$0xff] }
   0xa   :  { %8038 = vmatprep.subr.bf16.mxu1 %v8969_v10  ;;  %v8984_v25 = vld [vmem:[%s11762_s1 + $0x30] sm:$0xff]   ;;  %v8988_v30 = vld [vmem:[%s11762_s1 + $0x38] sm:$0xff]   ;;  %v8991_v37 = vld [vmem:[%s11762_s1 + $0x140] sm:$0xff]   ;;  %v68_v39 = vcombine.high %v28_v33, %v28_v33  ;;  %v75_v42 = vrot.slane %v28_v33, %v9779_v41 }
   0xb   :  { %8017 = vmatpush3.bf16.msra.mxu0 %v8968_v9  ;;  %v8985_v26 = vld [vmem:[%s11762_s1 + $0xf0] sm:$0xff]   ;;  %v8989_v31 = vld [vmem:[%s11762_s1 + $0xf8] sm:$0xff]   ;;  %v8994_v40 = vld [vmem:[%s11762_s1 + $0x1c0] sm:$0xff]  }
   0xc   :  { %8018 = vmatprep.subr.bf16.mxu0 %v8971_v12  ;;  %v8986_v28 = vld [vmem:[%s11762_s1 + $0xb0] sm:$0xff]   ;;  %v8990_v34 = vld [vmem:[%s11762_s1 + $0xb8] sm:$0xff]   ;;  %v82_v43 = vrot.slane %v68_v39, %v9779_v41  ;;  %v83_v44 = vcombine.high %v75_v42, %v75_v42  ;;  %v8993_v46 = vld [vmem:[%s11762_s1 + $0x100] sm:$0xff]   ;;  %v486_v47 = vpack.c.bf16 %v75_v42, %v75_v42 }
   0xd   :  { %8039 = vmatpush3.bf16.msra.mxu1 %v8970_v11  ;;  %v8995_v49 = vld [vmem:[%s11762_s1 + $0x180] sm:$0xff]   ;;  %v8996_v52 = vld [vmem:[%s11762_s1 + $0x148] sm:$0xff]   ;;  %v9000_v56 = vld [vmem:[%s11762_s1 + $0x150] sm:$0xff]  }
   0xe   :  { %8040 = vmatprep.subr.bf16.mxu1 %v8973_v14  ;;  %v84_v45 = vcombine.high %v82_v43, %v82_v43  ;;  %v488_v48 = vpack.c.bf16 %v82_v43, %v82_v43  ;;  %v487_v50 = vpack.c.bf16 %v83_v44, %v83_v44  ;;  %v8998_v53 = vld [vmem:[%s11762_s1 + $0x1c8] sm:$0xff]   ;;  %v9002_v57 = vld [vmem:[%s11762_s1 + $0x1d0] sm:$0xff]   ;;  %v9004_v60 = vld [vmem:[%s11762_s1 + $0x158] sm:$0xff]  }
   0xf   :  { %8019 = vmatpush3.bf16.msra.mxu0 %v8972_v13  ;;  %v8997_v54 = vld [vmem:[%s11762_s1 + $0x108] sm:$0xff]   ;;  %v9001_v58 = vld [vmem:[%s11762_s1 + $0x110] sm:$0xff]   ;;  %v9006_v61 = vld [vmem:[%s11762_s1 + $0x1d8] sm:$0xff]  }
  0x10   :  { %8020 = vmatprep.subr.bf16.mxu0 %v8975_v16  ;;  %v489_v51 = vpack.c.bf16 %v84_v45, %v84_v45  ;;  %5608 = vmatprep.mubr.bf16.mxu0 %v487_v50  ;;  %v8999_v55 = vld [vmem:[%s11762_s1 + $0x188] sm:$0xff]   ;;  %v9003_v59 = vld [vmem:[%s11762_s1 + $0x190] sm:$0xff]   ;;  %v9005_v62 = vld [vmem:[%s11762_s1 + $0x118] sm:$0xff]  }
  0x11   :  { %8041 = vmatpush3.bf16.msra.mxu1 %v8974_v15  ;;  %v9007_v63 = vld [vmem:[%s11762_s1 + $0x198] sm:$0xff]   ;;  %v9008_v0 = vld [vmem:[%s11762_s1 + $0x160] sm:$0xff]   ;;  %v9012_v4 = vld [vmem:[%s11762_s1 + $0x168] sm:$0xff]  }
  0x12   :  { %8042 = vmatprep.subr.bf16.mxu1 %v8977_v18  ;;  %5648 = vmatprep.mubr.bf16.mxu1 %v489_v51  ;;  %v9010_v1 = vld [vmem:[%s11762_s1 + $0x1e0] sm:$0xff]   ;;  %v9014_v5 = vld [vmem:[%s11762_s1 + $0x1e8] sm:$0xff]   ;;  %v9016_v8 = vld [vmem:[%s11762_s1 + $0x170] sm:$0xff]  }
  0x13   :  { %8021 = vmatpush3.bf16.msra.mxu0 %v8976_v17  ;;  %v9009_v2 = vld [vmem:[%s11762_s1 + $0x120] sm:$0xff]   ;;  %v9013_v6 = vld [vmem:[%s11762_s1 + $0x128] sm:$0xff]   ;;  %v9018_v9 = vld [vmem:[%s11762_s1 + $0x1f0] sm:$0xff]  }
  0x14   :  { %8022 = vmatprep.subr.bf16.mxu0 %v8979_v20  ;;  %v9011_v3 = vld [vmem:[%s11762_s1 + $0x1a0] sm:$0xff]   ;;  %v9015_v7 = vld [vmem:[%s11762_s1 + $0x1a8] sm:$0xff]   ;;  %v9017_v11 = vld [vmem:[%s11762_s1 + $0x130] sm:$0xff]  }
  0x15   :  { %8043 = vmatpush3.bf16.msra.mxu1 %v8978_v19  ;;  %v29_v10 = vld [vmem:[%s11761_s0 + $0x8] sm:$0xff]  ;;  %v9019_v14 = vld [vmem:[%s11762_s1 + $0x1b0] sm:$0xff]   ;;  %v9020_v15 = vld [vmem:[%s11762_s1 + $0x178] sm:$0xff]  }
  0x16   :  { %8044 = vmatprep.subr.bf16.mxu1 %v8981_v22  ;;  %v92_v12 = vrot.slane %v29_v10, %v9779_v41  ;;  %v85_v13 = vcombine.high %v29_v10, %v29_v10  ;;  %v9022_v18 = vld [vmem:[%s11762_s1 + $0x1f8] sm:$0xff]   ;;  %v9030_v32 = vld [vmem:[%s11762_s1 + $0x208] sm:$0xff]   ;;  %v9035_v35 = vld [vmem:[%s11762_s1 + $0x2d0] sm:$0xff]  }
  0x17   :  { %8023 = vmatpush3.bf16.msra.mxu0 %v8980_v21  ;;  %v9021_v19 = vld [vmem:[%s11762_s1 + $0x138] sm:$0xff]   ;;  %v9032_v33 = vld [vmem:[%s11762_s1 + $0x288] sm:$0xff]   ;;  %v9034_v36 = vld [vmem:[%s11762_s1 + $0x210] sm:$0xff]  }
  0x18   :  { %8024 = vmatprep.subr.bf16.mxu0 %v8983_v24  ;;  %v100_v16 = vcombine.high %v92_v12, %v92_v12  ;;  %v99_v17 = vrot.slane %v85_v13, %v9779_v41  ;;  %v9023_v22 = vld [vmem:[%s11762_s1 + $0x1b8] sm:$0xff]   ;;  %v490_v27 = vpack.c.bf16 %v92_v12, %v92_v12  ;;  %v9041_v43 = vld [vmem:[%s11762_s1 + $0x260] sm:$0xff]   ;;  %v9048_v50 = vld [vmem:[%s11762_s1 + $0x2a8] sm:$0xff]  }
  0x19   :  { %8045 = vmatpush3.bf16.msra.mxu1 %v8982_v23  ;;  %v9024_v23 = vld [vmem:[%s11762_s1 + $0x240] sm:$0xff]   ;;  %v9037_v38 = vld [vmem:[%s11762_s1 + $0x258] sm:$0xff]   ;;  %v9049_v51 = vld [vmem:[%s11762_s1 + $0x270] sm:$0xff]  }
  0x1a   :  { %8046 = vmatprep.subr.bf16.mxu1 %v8985_v26  ;;  %v491_v20 = vpack.c.bf16 %v100_v16, %v100_v16  ;;  %v101_v21 = vcombine.high %v99_v17, %v99_v17  ;;  %v9026_v26 = vld [vmem:[%s11762_s1 + $0x200] sm:$0xff]   ;;  %v9039_v39 = vld [vmem:[%s11762_s1 + $0x2d8] sm:$0xff]   ;;  %v9064_v10 = vld [vmem:[%s11762_s1 + $0x3c8] sm:$0xff]  }
  0x1b   :  { %8025 = vmatpush3.bf16.msra.mxu0 %v8984_v25  ;;  %v9027_v25 = vld [vmem:[%s11762_s1 + $0x2c0] sm:$0xff]   ;;  %v9040_v42 = vld [vmem:[%s11762_s1 + $0x298] sm:$0xff]   ;;  %v9065_v12 = vld [vmem:[%s11762_s1 + $0x388] sm:$0xff]  }
  0x1c   :  { %8026 = vmatprep.subr.bf16.mxu0 %v8987_v29  ;;  %v493_v24 = vpack.c.bf16 %v101_v21, %v101_v21  ;;  %v9028_v29 = vld [vmem:[%s11762_s1 + $0x280] sm:$0xff]   ;;  %v9066_v13 = vld [vmem:[%s11762_s1 + $0x350] sm:$0xff]  }
  0x1d   :  { %8047 = vmatpush3.bf16.msra.mxu1 %v8986_v28  ;;  %v492_v28 = vpack.c.bf16 %v99_v17, %v99_v17  ;;  %v9043_v44 = vld [vmem:[%s11762_s1 + $0x2e0] sm:$0xff]   ;;  %v9069_v16 = vld [vmem:[%s11762_s1 + $0x390] sm:$0xff]   ;;  %v9070_v17 = vld [vmem:[%s11762_s1 + $0x358] sm:$0xff]  }
  0x1e   :  { %8048 = vmatprep.subr.bf16.mxu1 %v8989_v31  ;;  %v9031_v31 = vld [vmem:[%s11762_s1 + $0x2c8] sm:$0xff]   ;;  %v9042_v45 = vld [vmem:[%s11762_s1 + $0x220] sm:$0xff]  }
  0x1f   :  { %8027 = vmatpush3.bf16.msra.mxu0 %v8988_v30  ;;  %v9029_v30 = vld [vmem:[%s11762_s1 + $0x248] sm:$0xff]   ;;  %v9074_v21 = vld [vmem:[%s11762_s1 + $0x360] sm:$0xff]  }
  0x20   :  { %8056 = vmatprep.subr.bf16.mxu0 %v8991_v37  ;;  %v9036_v37 = vld [vmem:[%s11762_s1 + $0x290] sm:$0xff]  }
  0x21   :  { %8049 = vmatpush3.bf16.msra.mxu1 %v8990_v34  ;;  %v9033_v34 = vld [vmem:[%s11762_s1 + $0x250] sm:$0xff]  }
  0x22   :  { %8078 = vmatprep.subr.bf16.mxu1 %v8994_v40  ;;  %5609 = vmatmul.mubr.bf16.vlgmr.msra.gmra.mrb[0].mxu0 %v486_v47  ;;  %v9038_v40 = vld [vmem:[%s11762_s1 + $0x218] sm:$0xff]   ;;  %v9045_v47 = vld [vmem:[%s11762_s1 + $0x268] sm:$0xff]  }
  0x23   :  { %8057 = vmatpush3.bf16.msra.mxu0 %v8993_v46  ;;  %5688 = vmatprep.mubr.bf16.mxu0 %v491_v20  ;;  %v9044_v46 = vld [vmem:[%s11762_s1 + $0x2a0] sm:$0xff]   ;;  %v9073_v20 = vld [vmem:[%s11762_s1 + $0x398] sm:$0xff]  }
  0x24   :  { %5649 = vmatmul.mubr.bf16.vlgmr.msra.gmra.mrb[0].mxu1 %v488_v48  ;;  %8058 = vmatprep.subr.bf16.mxu0 %v8996_v52  ;;  %v9047_v48 = vld [vmem:[%s11762_s1 + $0x2e8] sm:$0xff]   ;;  %v9051_v52 = vld [vmem:[%s11762_s1 + $0x2f0] sm:$0xff]  }
  0x25   :  { %8079 = vmatpush3.bf16.msra.mxu1 %v8995_v49  ;;  %5728 = vmatprep.mubr.bf16.mxu1 %v493_v24  ;;  %v9046_v49 = vld [vmem:[%s11762_s1 + $0x228] sm:$0xff]   ;;  %v9077_v24 = vld [vmem:[%s11762_s1 + $0x3a0] sm:$0xff]  }
  0x26   :  { %8080 = vmatprep.subr.bf16.mxu1 %v8998_v53  ;;  %v30_v53 = vld [vmem:[%s11761_s0 + $0x10] sm:$0xff] }
  0x27   :  { %8059 = vmatpush3.bf16.msra.mxu0 %v8997_v54  ;;  %v9050_v54 = vld [vmem:[%s11762_s1 + $0x230] sm:$0xff]  }
  0x28   :  { %8060 = vmatprep.subr.bf16.mxu0 %v9000_v56  ;;  %v102_v56 = vcombine.high %v30_v53, %v30_v53 }
  0x29   :  { %8081 = vmatpush3.bf16.msra.mxu1 %v8999_v55  ;;  %v109_v55 = vrot.slane %v30_v53, %v9779_v41  ;;  %v9097_v53 = vld [vmem:[%s11762_s1 + $0x4c8] sm:$0xff]  }
  0x2a   :  { %8082 = vmatprep.subr.bf16.mxu1 %v9002_v57  ;;  %v9052_v57 = vld [vmem:[%s11762_s1 + $0x2b0] sm:$0xff]  }
  0x2b   :  { %8061 = vmatpush3.bf16.msra.mxu0 %v9001_v58  ;;  %v9053_v58 = vld [vmem:[%s11762_s1 + $0x278] sm:$0xff]  }
  0x2c   :  { %8062 = vmatprep.subr.bf16.mxu0 %v9004_v60  ;;  %v116_v60 = vrot.slane %v102_v56, %v9779_v41  ;;  %v9099_v56 = vld [vmem:[%s11762_s1 + $0x450] sm:$0xff]  }
  0x2d   :  { %8083 = vmatpush3.bf16.msra.mxu1 %v9003_v59  ;;  %v117_v59 = vcombine.high %v109_v55, %v109_v55 }
  0x2e   :  { %8084 = vmatprep.subr.bf16.mxu1 %v9006_v61  ;;  %v9055_v61 = vld [vmem:[%s11762_s1 + $0x2f8] sm:$0xff]  }
  0x2f   :  { %8063 = vmatpush3.bf16.msra.mxu0 %v9005_v62  ;;  %v9054_v62 = vld [vmem:[%s11762_s1 + $0x238] sm:$0xff]  }
  0x30   :  { %8064 = vmatprep.subr.bf16.mxu0 %v9008_v0  ;;  %v118_v0 = vcombine.high %v116_v60, %v116_v60 }
  0x31   :  { %8085 = vmatpush3.bf16.msra.mxu1 %v9007_v63  ;;  %v495_v63 = vpack.c.bf16 %v117_v59, %v117_v59  ;;  %v9102_v59 = vld [vmem:[%s11762_s1 + $0x490] sm:$0xff]  }
  0x32   :  { %8086 = vmatprep.subr.bf16.mxu1 %v9010_v1  ;;  %v9056_v1 = vld [vmem:[%s11762_s1 + $0x2b8] sm:$0xff]  }
  0x33   :  { %8065 = vmatpush3.bf16.msra.mxu0 %v9009_v2  ;;  %v9057_v2 = vld [vmem:[%s11762_s1 + $0x340] sm:$0xff]  }
  0x34   :  { %8066 = vmatprep.subr.bf16.mxu0 %v9012_v4  ;;  %v9060_v4 = vld [vmem:[%s11762_s1 + $0x3c0] sm:$0xff]  }
  0x35   :  { %8087 = vmatpush3.bf16.msra.mxu1 %v9011_v3  ;;  %v497_v3 = vpack.c.bf16 %v118_v0, %v118_v0  ;;  %v9107_v0 = vld [vmem:[%s11762_s1 + $0x460] sm:$0xff]  }
  0x36   :  { %8088 = vmatprep.subr.bf16.mxu1 %v9014_v5  ;;  %v9059_v5 = vld [vmem:[%s11762_s1 + $0x300] sm:$0xff]  }
  0x37   :  { %8067 = vmatpush3.bf16.msra.mxu0 %v9013_v6  ;;  %v494_v6 = vpack.c.bf16 %v109_v55, %v109_v55  ;;  %v9098_v55 = vld [vmem:[%s11762_s1 + $0x488] sm:$0xff]  }
  0x38   :  { %8068 = vmatprep.subr.bf16.mxu0 %v9016_v8  ;;  %v9061_v8 = vld [vmem:[%s11762_s1 + $0x380] sm:$0xff]  }
  0x39   :  { %8089 = vmatpush3.bf16.msra.mxu1 %v9015_v7  ;;  %v496_v7 = vpack.c.bf16 %v116_v60, %v116_v60  ;;  %v9103_v60 = vld [vmem:[%s11762_s1 + $0x458] sm:$0xff]  }
  0x3a   :  { %8090 = vmatprep.subr.bf16.mxu1 %v9018_v9  ;;  %v9062_v9 = vld [vmem:[%s11762_s1 + $0x348] sm:$0xff]  }
  0x3b   :  { %8069 = vmatpush3.bf16.msra.mxu0 %v9017_v11  ;;  %v9063_v11 = vld [vmem:[%s11762_s1 + $0x308] sm:$0xff]  }
  0x3c   :  { %8070 = vmatprep.subr.bf16.mxu0 %v9020_v15  ;;  %v9067_v15 = vld [vmem:[%s11762_s1 + $0x310] sm:$0xff]  }
  0x3d   :  { %8091 = vmatpush3.bf16.msra.mxu1 %v9019_v14  ;;  %v9068_v14 = vld [vmem:[%s11762_s1 + $0x3d0] sm:$0xff]  }
  0x3e   :  { %8092 = vmatprep.subr.bf16.mxu1 %v9022_v18  ;;  %v9072_v18 = vld [vmem:[%s11762_s1 + $0x3d8] sm:$0xff]  }
  0x3f   :  { %8071 = vmatpush3.bf16.msra.mxu0 %v9021_v19  ;;  %v9071_v19 = vld [vmem:[%s11762_s1 + $0x318] sm:$0xff]  }
  0x40   :  { %8100 = vmatprep.subr.bf16.mxu0 %v9024_v23  ;;  %v9075_v23 = vld [vmem:[%s11762_s1 + $0x320] sm:$0xff]  }
  0x41   :  { %8093 = vmatpush3.bf16.msra.mxu1 %v9023_v22  ;;  %v9076_v22 = vld [vmem:[%s11762_s1 + $0x3e0] sm:$0xff]  }
  0x42   :  { %8122 = vmatprep.subr.bf16.mxu1 %v9027_v25  ;;  %5689 = vmatmul.mubr.bf16.vlgmr.msra.gmra.mrb[4].mxu0 %v490_v27  ;;  %v9078_v25 = vld [vmem:[%s11762_s1 + $0x368] sm:$0xff]  }
  0x43   :  { %8101 = vmatpush3.bf16.msra.mxu0 %v9026_v26  ;;  %5768 = vmatprep.mubr.bf16.mxu0 %v495_v63  ;;  %v9080_v26 = vld [vmem:[%s11762_s1 + $0x3e8] sm:$0xff]   ;;  %v9106_v63 = vld [vmem:[%s11762_s1 + $0x498] sm:$0xff]  }
  0x44   :  { %5729 = vmatmul.mubr.bf16.vlgmr.msra.gmra.mrb[4].mxu1 %v492_v28  ;;  %8102 = vmatprep.subr.bf16.mxu0 %v9029_v30  ;;  %v9079_v27 = vld [vmem:[%s11762_s1 + $0x328] sm:$0xff]   ;;  %v9084_v30 = vld [vmem:[%s11762_s1 + $0x3f0] sm:$0xff]  }
  0x45   :  { %8123 = vmatpush3.bf16.msra.mxu1 %v9028_v29  ;;  %5808 = vmatprep.mubr.bf16.mxu1 %v497_v3  ;;  %v9081_v28 = vld [vmem:[%s11762_s1 + $0x3a8] sm:$0xff]   ;;  %v9082_v29 = vld [vmem:[%s11762_s1 + $0x370] sm:$0xff]   ;;  %v9110_v3 = vld [vmem:[%s11762_s1 + $0x4a0] sm:$0xff]  }
  0x46   :  { %8124 = vmatprep.subr.bf16.mxu1 %v9031_v31  ;;  %v9083_v31 = vld [vmem:[%s11762_s1 + $0x330] sm:$0xff]  }
  0x47   :  { %8103 = vmatpush3.bf16.msra.mxu0 %v9030_v32  ;;  %v31_v32 = vld [vmem:[%s11761_s0 + $0x18] sm:$0xff] }
  0x48   :  { %8104 = vmatprep.subr.bf16.mxu0 %v9033_v34  ;;  %v126_v34 = vrot.slane %v31_v32, %v9779_v41 }
  0x49   :  { %8125 = vmatpush3.bf16.msra.mxu1 %v9032_v33  ;;  %v9085_v33 = vld [vmem:[%s11762_s1 + $0x3b0] sm:$0xff]  }
  0x4a   :  { %8126 = vmatprep.subr.bf16.mxu1 %v9035_v35  ;;  %v119_v35 = vcombine.high %v31_v32, %v31_v32  ;;  %v9129_v32 = vld [vmem:[%s11762_s1 + $0x508] sm:$0xff]  }
  0x4b   :  { %8105 = vmatpush3.bf16.msra.mxu0 %v9034_v36  ;;  %v9086_v36 = vld [vmem:[%s11762_s1 + $0x378] sm:$0xff]  }
  0x4c   :  { %8106 = vmatprep.subr.bf16.mxu0 %v9037_v38  ;;  %v134_v38 = vcombine.high %v126_v34, %v126_v34 }
  0x4d   :  { %8127 = vmatpush3.bf16.msra.mxu1 %v9036_v37  ;;  %v9088_v37 = vld [vmem:[%s11762_s1 + $0x3f8] sm:$0xff]  }
  0x4e   :  { %8128 = vmatprep.subr.bf16.mxu1 %v9039_v39  ;;  %v133_v39 = vrot.slane %v119_v35, %v9779_v41  ;;  %v9134_v35 = vld [vmem:[%s11762_s1 + $0x5d0] sm:$0xff]  }
  0x4f   :  { %8107 = vmatpush3.bf16.msra.mxu0 %v9038_v40  ;;  %v9087_v40 = vld [vmem:[%s11762_s1 + $0x338] sm:$0xff]  }
  0x50   :  { %8108 = vmatprep.subr.bf16.mxu0 %v9041_v43  ;;  %v9089_v43 = vld [vmem:[%s11762_s1 + $0x3b8] sm:$0xff]  }
  0x51   :  { %8129 = vmatpush3.bf16.msra.mxu1 %v9040_v42  ;;  %v499_v42 = vpack.c.bf16 %v134_v38, %v134_v38  ;;  %v9136_v38 = vld [vmem:[%s11762_s1 + $0x558] sm:$0xff]  }
  0x52   :  { %8130 = vmatprep.subr.bf16.mxu1 %v9043_v44  ;;  %v135_v44 = vcombine.high %v133_v39, %v133_v39 }
  0x53   :  { %8109 = vmatpush3.bf16.msra.mxu0 %v9042_v45  ;;  %v9090_v45 = vld [vmem:[%s11762_s1 + $0x440] sm:$0xff]  }
  0x54   :  { %8110 = vmatprep.subr.bf16.mxu0 %v9045_v47  ;;  %v9093_v47 = vld [vmem:[%s11762_s1 + $0x4c0] sm:$0xff]  }
  0x55   :  { %8131 = vmatpush3.bf16.msra.mxu1 %v9044_v46  ;;  %v501_v46 = vpack.c.bf16 %v135_v44, %v135_v44  ;;  %v9142_v44 = vld [vmem:[%s11762_s1 + $0x5e0] sm:$0xff]  }
  0x56   :  { %8132 = vmatprep.subr.bf16.mxu1 %v9047_v48  ;;  %v9092_v48 = vld [vmem:[%s11762_s1 + $0x400] sm:$0xff]  }
  0x57   :  { %8111 = vmatpush3.bf16.msra.mxu0 %v9046_v49  ;;  %v498_v49 = vpack.c.bf16 %v126_v34, %v126_v34  ;;  %v9132_v34 = vld [vmem:[%s11762_s1 + $0x550] sm:$0xff]  }
  0x58   :  { %8112 = vmatprep.subr.bf16.mxu0 %v9049_v51  ;;  %v9094_v51 = vld [vmem:[%s11762_s1 + $0x480] sm:$0xff]  }
  0x59   :  { %8133 = vmatpush3.bf16.msra.mxu1 %v9048_v50  ;;  %v500_v50 = vpack.c.bf16 %v133_v39, %v133_v39  ;;  %v9138_v39 = vld [vmem:[%s11762_s1 + $0x5d8] sm:$0xff]  }
  0x5a   :  { %8134 = vmatprep.subr.bf16.mxu1 %v9051_v52  ;;  %v9095_v52 = vld [vmem:[%s11762_s1 + $0x448] sm:$0xff]  }
  0x5b   :  { %8113 = vmatpush3.bf16.msra.mxu0 %v9050_v54  ;;  %v9096_v54 = vld [vmem:[%s11762_s1 + $0x408] sm:$0xff]  }
  0x5c   :  { %8114 = vmatprep.subr.bf16.mxu0 %v9053_v58  ;;  %v9100_v58 = vld [vmem:[%s11762_s1 + $0x410] sm:$0xff]  }
  0x5d   :  { %8135 = vmatpush3.bf16.msra.mxu1 %v9052_v57  ;;  %v9101_v57 = vld [vmem:[%s11762_s1 + $0x4d0] sm:$0xff]  }
  0x5e   :  { %8136 = vmatprep.subr.bf16.mxu1 %v9055_v61  ;;  %v9105_v61 = vld [vmem:[%s11762_s1 + $0x4d8] sm:$0xff]  }
  0x5f   :  { %8115 = vmatpush3.bf16.msra.mxu0 %v9054_v62  ;;  %v9104_v62 = vld [vmem:[%s11762_s1 + $0x418] sm:$0xff]  }
  0x60   :  { %8144 = vmatprep.subr.bf16.mxu0 %v9057_v2  ;;  %v9108_v2 = vld [vmem:[%s11762_s1 + $0x420] sm:$0xff]  }
  0x61   :  { %8137 = vmatpush3.bf16.msra.mxu1 %v9056_v1  ;;  %v9109_v1 = vld [vmem:[%s11762_s1 + $0x4e0] sm:$0xff]  }
  0x62   :  { %8166 = vmatprep.subr.bf16.mxu1 %v9060_v4  ;;  %5769 = vmatmul.mubr.bf16.vlgmr.msra.gmra.mrb[8].mxu0 %v494_v6  ;;  %v9111_v4 = vld [vmem:[%s11762_s1 + $0x468] sm:$0xff]  }
  0x63   :  { %8145 = vmatpush3.bf16.msra.mxu0 %v9059_v5  ;;  %5848 = vmatprep.mubr.bf16.mxu0 %v499_v42  ;;  %v9113_v5 = vld [vmem:[%s11762_s1 + $0x4e8] sm:$0xff]   ;;  %v9139_v42 = vld [vmem:[%s11762_s1 + $0x598] sm:$0xff]  }
  0x64   :  { %5809 = vmatmul.mubr.bf16.vlgmr.msra.gmra.mrb[8].mxu1 %v496_v7  ;;  %8146 = vmatprep.subr.bf16.mxu0 %v9062_v9  ;;  %v9112_v6 = vld [vmem:[%s11762_s1 + $0x428] sm:$0xff]   ;;  %v9117_v9 = vld [vmem:[%s11762_s1 + $0x4f0] sm:$0xff]  }
  0x65   :  { %8167 = vmatpush3.bf16.msra.mxu1 %v9061_v8  ;;  %5888 = vmatprep.mubr.bf16.mxu1 %v501_v46  ;;  %v9114_v7 = vld [vmem:[%s11762_s1 + $0x4a8] sm:$0xff]   ;;  %v9115_v8 = vld [vmem:[%s11762_s1 + $0x470] sm:$0xff]   ;;  %v9143_v46 = vld [vmem:[%s11762_s1 + $0x5a0] sm:$0xff]  }
  0x66   :  { %8168 = vmatprep.subr.bf16.mxu1 %v9064_v10  ;;  %v9116_v10 = vld [vmem:[%s11762_s1 + $0x430] sm:$0xff]  }
  0x67   :  { %8147 = vmatpush3.bf16.msra.mxu0 %v9063_v11  ;;  %v32_v11 = vld [vmem:[%s11761_s0 + $0x20] sm:$0xff] }
  0x68   :  { %8148 = vmatprep.subr.bf16.mxu0 %v9066_v13  ;;  %v143_v13 = vrot.slane %v32_v11, %v9779_v41 }
  0x69   :  { %8169 = vmatpush3.bf16.msra.mxu1 %v9065_v12  ;;  %v9118_v12 = vld [vmem:[%s11762_s1 + $0x4b0] sm:$0xff]  }
  0x6a   :  { %8170 = vmatprep.subr.bf16.mxu1 %v9068_v14  ;;  %v136_v14 = vcombine.high %v32_v11, %v32_v11  ;;  %v9162_v11 = vld [vmem:[%s11762_s1 + $0x608] sm:$0xff]  }
  0x6b   :  { %8149 = vmatpush3.bf16.msra.mxu0 %v9067_v15  ;;  %v9119_v15 = vld [vmem:[%s11762_s1 + $0x478] sm:$0xff]  }
  0x6c   :  { %8150 = vmatprep.subr.bf16.mxu0 %v9070_v17  ;;  %v151_v17 = vcombine.high %v143_v13, %v143_v13 }
  0x6d   :  { %8171 = vmatpush3.bf16.msra.mxu1 %v9069_v16  ;;  %v9121_v16 = vld [vmem:[%s11762_s1 + $0x4f8] sm:$0xff]  }
  0x6e   :  { %8172 = vmatprep.subr.bf16.mxu1 %v9072_v18  ;;  %v150_v18 = vrot.slane %v136_v14, %v9779_v41  ;;  %v9167_v14 = vld [vmem:[%s11762_s1 + $0x6d0] sm:$0xff]  }
  0x6f   :  { %8151 = vmatpush3.bf16.msra.mxu0 %v9071_v19  ;;  %v9120_v19 = vld [vmem:[%s11762_s1 + $0x438] sm:$0xff]  }
  0x70   :  { %8152 = vmatprep.subr.bf16.mxu0 %v9074_v21  ;;  %v9122_v21 = vld [vmem:[%s11762_s1 + $0x4b8] sm:$0xff]  }
  0x71   :  { %8173 = vmatpush3.bf16.msra.mxu1 %v9073_v20  ;;  %v503_v20 = vpack.c.bf16 %v151_v17, %v151_v17  ;;  %v9169_v17 = vld [vmem:[%s11762_s1 + $0x658] sm:$0xff]  }
  0x72   :  { %8174 = vmatprep.subr.bf16.mxu1 %v9076_v22  ;;  %v152_v22 = vcombine.high %v150_v18, %v150_v18 }
  0x73   :  { %8153 = vmatpush3.bf16.msra.mxu0 %v9075_v23  ;;  %v9123_v23 = vld [vmem:[%s11762_s1 + $0x540] sm:$0xff]  }
  0x74   :  { %8154 = vmatprep.subr.bf16.mxu0 %v9078_v25  ;;  %v9126_v25 = vld [vmem:[%s11762_s1 + $0x5c0] sm:$0xff]  }
  0x75   :  { %8175 = vmatpush3.bf16.msra.mxu1 %v9077_v24  ;;  %v505_v24 = vpack.c.bf16 %v152_v22, %v152_v22  ;;  %v9175_v22 = vld [vmem:[%s11762_s1 + $0x6e0] sm:$0xff]  }
  0x76   :  { %8176 = vmatprep.subr.bf16.mxu1 %v9080_v26  ;;  %v9125_v26 = vld [vmem:[%s11762_s1 + $0x500] sm:$0xff]  }
  0x77   :  { %8155 = vmatpush3.bf16.msra.mxu0 %v9079_v27  ;;  %v502_v27 = vpack.c.bf16 %v143_v13, %v143_v13  ;;  %v9165_v13 = vld [vmem:[%s11762_s1 + $0x650] sm:$0xff]  }
  0x78   :  { %8156 = vmatprep.subr.bf16.mxu0 %v9082_v29  ;;  %v9127_v29 = vld [vmem:[%s11762_s1 + $0x580] sm:$0xff]  }
  0x79   :  { %8177 = vmatpush3.bf16.msra.mxu1 %v9081_v28  ;;  %v504_v28 = vpack.c.bf16 %v150_v18, %v150_v18  ;;  %v9171_v18 = vld [vmem:[%s11762_s1 + $0x6d8] sm:$0xff]  }
  0x7a   :  { %8178 = vmatprep.subr.bf16.mxu1 %v9084_v30  ;;  %v9128_v30 = vld [vmem:[%s11762_s1 + $0x548] sm:$0xff]  }
  0x7b   :  { %8157 = vmatpush3.bf16.msra.mxu0 %v9083_v31  ;;  %v9130_v31 = vld [vmem:[%s11762_s1 + $0x5c8] sm:$0xff]  }
  0x7c   :  { %8158 = vmatprep.subr.bf16.mxu0 %v9086_v36  ;;  %v9133_v36 = vld [vmem:[%s11762_s1 + $0x510] sm:$0xff]  }
  0x7d   :  { %8179 = vmatpush3.bf16.msra.mxu1 %v9085_v33  ;;  %v9131_v33 = vld [vmem:[%s11762_s1 + $0x588] sm:$0xff]  }
  0x7e   :  { %8180 = vmatprep.subr.bf16.mxu1 %v9088_v37  ;;  %v9135_v37 = vld [vmem:[%s11762_s1 + $0x590] sm:$0xff]  }
  0x7f   :  { %8159 = vmatpush3.bf16.msra.mxu0 %v9087_v40  ;;  %v9137_v40 = vld [vmem:[%s11762_s1 + $0x518] sm:$0xff]  }
  0x80   :  { %8188 = vmatprep.subr.bf16.mxu0 %v9090_v45  ;;  %v9141_v45 = vld [vmem:[%s11762_s1 + $0x520] sm:$0xff]  }
  0x81   :  { %8181 = vmatpush3.bf16.msra.mxu1 %v9089_v43  ;;  %v9140_v43 = vld [vmem:[%s11762_s1 + $0x560] sm:$0xff]  }
  0x82   :  { %8210 = vmatprep.subr.bf16.mxu1 %v9093_v47  ;;  %5849 = vmatmul.mubr.bf16.vlgmr.msra.gmra.mrb[12].mxu0 %v498_v49  ;;  %v9144_v47 = vld [vmem:[%s11762_s1 + $0x568] sm:$0xff]  }
  0x83   :  { %8189 = vmatpush3.bf16.msra.mxu0 %v9092_v48  ;;  %5928 = vmatprep.mubr.bf16.mxu0 %v503_v20  ;;  %v9146_v48 = vld [vmem:[%s11762_s1 + $0x5e8] sm:$0xff]   ;;  %v9172_v20 = vld [vmem:[%s11762_s1 + $0x698] sm:$0xff]  }
  0x84   :  { %5889 = vmatmul.mubr.bf16.vlgmr.msra.gmra.mrb[12].mxu1 %v500_v50  ;;  %8190 = vmatprep.subr.bf16.mxu0 %v9095_v52  ;;  %v9145_v49 = vld [vmem:[%s11762_s1 + $0x528] sm:$0xff]   ;;  %v9150_v52 = vld [vmem:[%s11762_s1 + $0x5f0] sm:$0xff]  }
  0x85   :  { %8211 = vmatpush3.bf16.msra.mxu1 %v9094_v51  ;;  %5968 = vmatprep.mubr.bf16.mxu1 %v505_v24  ;;  %v9147_v50 = vld [vmem:[%s11762_s1 + $0x5a8] sm:$0xff]   ;;  %v9148_v51 = vld [vmem:[%s11762_s1 + $0x570] sm:$0xff]   ;;  %v9176_v24 = vld [vmem:[%s11762_s1 + $0x6a0] sm:$0xff]  }
  0x86   :  { %8212 = vmatprep.subr.bf16.mxu1 %v9097_v53  ;;  %v9149_v53 = vld [vmem:[%s11762_s1 + $0x530] sm:$0xff]  }
  0x87   :  { %8191 = vmatpush3.bf16.msra.mxu0 %v9096_v54  ;;  %v33_v54 = vld [vmem:[%s11761_s0 + $0x28] sm:$0xff] }
  0x88   :  { %8192 = vmatprep.subr.bf16.mxu0 %v9099_v56  ;;  %v160_v56 = vrot.slane %v33_v54, %v9779_v41 }
  0x89   :  { %8213 = vmatpush3.bf16.msra.mxu1 %v9098_v55  ;;  %v9151_v55 = vld [vmem:[%s11762_s1 + $0x5b0] sm:$0xff]  }
  0x8a   :  { %8214 = vmatprep.subr.bf16.mxu1 %v9101_v57  ;;  %v153_v57 = vcombine.high %v33_v54, %v33_v54  ;;  %v9195_v54 = vld [vmem:[%s11762_s1 + $0x708] sm:$0xff]  }
  0x8b   :  { %8193 = vmatpush3.bf16.msra.mxu0 %v9100_v58  ;;  %v9152_v58 = vld [vmem:[%s11762_s1 + $0x578] sm:$0xff]  }
  0x8c   :  { %8194 = vmatprep.subr.bf16.mxu0 %v9103_v60  ;;  %v168_v60 = vcombine.high %v160_v56, %v160_v56 }
  0x8d   :  { %8215 = vmatpush3.bf16.msra.mxu1 %v9102_v59  ;;  %v9154_v59 = vld [vmem:[%s11762_s1 + $0x5f8] sm:$0xff]  }
  0x8e   :  { %8216 = vmatprep.subr.bf16.mxu1 %v9105_v61  ;;  %v167_v61 = vrot.slane %v153_v57, %v9779_v41  ;;  %v9200_v57 = vld [vmem:[%s11762_s1 + $0x7d0] sm:$0xff]  }
  0x8f   :  { %8195 = vmatpush3.bf16.msra.mxu0 %v9104_v62  ;;  %v9153_v62 = vld [vmem:[%s11762_s1 + $0x538] sm:$0xff]  }
  0x90   :  { %8196 = vmatprep.subr.bf16.mxu0 %v9107_v0  ;;  %v9155_v0 = vld [vmem:[%s11762_s1 + $0x5b8] sm:$0xff]  }
  0x91   :  { %8217 = vmatpush3.bf16.msra.mxu1 %v9106_v63  ;;  %v507_v63 = vpack.c.bf16 %v168_v60, %v168_v60  ;;  %v9202_v60 = vld [vmem:[%s11762_s1 + $0x758] sm:$0xff]  }
  0x92   :  { %8218 = vmatprep.subr.bf16.mxu1 %v9109_v1  ;;  %v169_v1 = vcombine.high %v167_v61, %v167_v61 }
  0x93   :  { %8197 = vmatpush3.bf16.msra.mxu0 %v9108_v2  ;;  %v9156_v2 = vld [vmem:[%s11762_s1 + $0x640] sm:$0xff]  }
  0x94   :  { %8198 = vmatprep.subr.bf16.mxu0 %v9111_v4  ;;  %v9159_v4 = vld [vmem:[%s11762_s1 + $0x6c0] sm:$0xff]  }
  0x95   :  { %8219 = vmatpush3.bf16.msra.mxu1 %v9110_v3  ;;  %v509_v3 = vpack.c.bf16 %v169_v1, %v169_v1  ;;  %v9208_v1 = vld [vmem:[%s11762_s1 + $0x7e0] sm:$0xff]  }
  0x96   :  { %8220 = vmatprep.subr.bf16.mxu1 %v9113_v5  ;;  %v9158_v5 = vld [vmem:[%s11762_s1 + $0x600] sm:$0xff]  }
  0x97   :  { %8199 = vmatpush3.bf16.msra.mxu0 %v9112_v6  ;;  %v506_v6 = vpack.c.bf16 %v160_v56, %v160_v56  ;;  %v9198_v56 = vld [vmem:[%s11762_s1 + $0x750] sm:$0xff]  }
  0x98   :  { %8200 = vmatprep.subr.bf16.mxu0 %v9115_v8  ;;  %v9160_v8 = vld [vmem:[%s11762_s1 + $0x680] sm:$0xff]  }
  0x99   :  { %8221 = vmatpush3.bf16.msra.mxu1 %v9114_v7  ;;  %v508_v7 = vpack.c.bf16 %v167_v61, %v167_v61  ;;  %v9204_v61 = vld [vmem:[%s11762_s1 + $0x7d8] sm:$0xff]  }
  0x9a   :  { %8222 = vmatprep.subr.bf16.mxu1 %v9117_v9  ;;  %v9161_v9 = vld [vmem:[%s11762_s1 + $0x648] sm:$0xff]  }
  0x9b   :  { %8201 = vmatpush3.bf16.msra.mxu0 %v9116_v10  ;;  %v9163_v10 = vld [vmem:[%s11762_s1 + $0x6c8] sm:$0xff]  }
  0x9c   :  { %8202 = vmatprep.subr.bf16.mxu0 %v9119_v15  ;;  %v9166_v15 = vld [vmem:[%s11762_s1 + $0x610] sm:$0xff]  }
  0x9d   :  { %8223 = vmatpush3.bf16.msra.mxu1 %v9118_v12  ;;  %v9164_v12 = vld [vmem:[%s11762_s1 + $0x688] sm:$0xff]  }
  0x9e   :  { %8224 = vmatprep.subr.bf16.mxu1 %v9121_v16  ;;  %v9168_v16 = vld [vmem:[%s11762_s1 + $0x690] sm:$0xff]  }
  0x9f   :  { %8203 = vmatpush3.bf16.msra.mxu0 %v9120_v19  ;;  %v9170_v19 = vld [vmem:[%s11762_s1 + $0x618] sm:$0xff]  }
  0xa0   :  { %8232 = vmatprep.subr.bf16.mxu0 %v9123_v23  ;;  %v9174_v23 = vld [vmem:[%s11762_s1 + $0x620] sm:$0xff]  }
  0xa1   :  { %8225 = vmatpush3.bf16.msra.mxu1 %v9122_v21  ;;  %v9173_v21 = vld [vmem:[%s11762_s1 + $0x660] sm:$0xff]  }
  0xa2   :  { %8254 = vmatprep.subr.bf16.mxu1 %v9126_v25  ;;  %5929 = vmatmul.mubr.bf16.vlgmr.msra.gmra.mrb[16].mxu0 %v502_v27  ;;  %v9177_v25 = vld [vmem:[%s11762_s1 + $0x668] sm:$0xff]  }
  0xa3   :  { %8233 = vmatpush3.bf16.msra.mxu0 %v9125_v26  ;;  %6008 = vmatprep.mubr.bf16.mxu0 %v507_v63  ;;  %v9179_v26 = vld [vmem:[%s11762_s1 + $0x6e8] sm:$0xff]   ;;  %v9205_v63 = vld [vmem:[%s11762_s1 + $0x798] sm:$0xff]  }
  0xa4   :  { %5969 = vmatmul.mubr.bf16.vlgmr.msra.gmra.mrb[16].mxu1 %v504_v28  ;;  %8234 = vmatprep.subr.bf16.mxu0 %v9128_v30  ;;  %v9178_v27 = vld [vmem:[%s11762_s1 + $0x628] sm:$0xff]   ;;  %v9183_v30 = vld [vmem:[%s11762_s1 + $0x6f0] sm:$0xff]  }
  0xa5   :  { %8255 = vmatpush3.bf16.msra.mxu1 %v9127_v29  ;;  %6048 = vmatprep.mubr.bf16.mxu1 %v509_v3  ;;  %v9180_v28 = vld [vmem:[%s11762_s1 + $0x6a8] sm:$0xff]   ;;  %v9181_v29 = vld [vmem:[%s11762_s1 + $0x670] sm:$0xff]   ;;  %v9209_v3 = vld [vmem:[%s11762_s1 + $0x7a0] sm:$0xff]  }
  0xa6   :  { %8256 = vmatprep.subr.bf16.mxu1 %v9130_v31  ;;  %v9182_v31 = vld [vmem:[%s11762_s1 + $0x630] sm:$0xff]  }
  0xa7   :  { %8235 = vmatpush3.bf16.msra.mxu0 %v9129_v32  ;;  %v9184_v32 = vld [vmem:[%s11762_s1 + $0x6b0] sm:$0xff]  }
  0xa8   :  { %8236 = vmatprep.subr.bf16.mxu0 %v9132_v34  ;;  %v9185_v34 = vld [vmem:[%s11762_s1 + $0x678] sm:$0xff]  }
  0xa9   :  { %8257 = vmatpush3.bf16.msra.mxu1 %v9131_v33  ;;  %v34_v33 = vld [vmem:[%s11761_s0 + $0x30] sm:$0xff] }
  0xaa   :  { %8258 = vmatprep.subr.bf16.mxu1 %v9134_v35  ;;  %v177_v35 = vrot.slane %v34_v33, %v9779_v41 }
  0xab   :  { %8237 = vmatpush3.bf16.msra.mxu0 %v9133_v36  ;;  %v170_v36 = vcombine.high %v34_v33, %v34_v33  ;;  %v9221_v33 = vld [vmem:[%s11762_s1 + $0x7b8] sm:$0xff]  }
  0xac   :  { %8238 = vmatprep.subr.bf16.mxu0 %v9136_v38  ;;  %v185_v38 = vcombine.high %v177_v35, %v177_v35 }
  0xad   :  { %8259 = vmatpush3.bf16.msra.mxu1 %v9135_v37  ;;  %v9187_v37 = vld [vmem:[%s11762_s1 + $0x6f8] sm:$0xff]  }
  0xae   :  { %8260 = vmatprep.subr.bf16.mxu1 %v9138_v39  ;;  %v184_v39 = vrot.slane %v170_v36, %v9779_v41 }
  0xaf   :  { %8239 = vmatpush3.bf16.msra.mxu0 %v9137_v40  ;;  %v9186_v40 = vld [vmem:[%s11762_s1 + $0x638] sm:$0xff]  }
  0xb0   :  { %8240 = vmatprep.subr.bf16.mxu0 %v9140_v43  ;;  %v9188_v43 = vld [vmem:[%s11762_s1 + $0x6b8] sm:$0xff]  }
  0xb1   :  { %8261 = vmatpush3.bf16.msra.mxu1 %v9139_v42  ;;  %v511_v42 = vpack.c.bf16 %v185_v38, %v185_v38  ;;  %v9225_v38 = vld [vmem:[%s11762_s1 + $0x8c0] sm:$0xff]  }
  0xb2   :  { %8262 = vmatprep.subr.bf16.mxu1 %v9142_v44  ;;  %v186_v44 = vcombine.high %v184_v39, %v184_v39 }
  0xb3   :  { %8241 = vmatpush3.bf16.msra.mxu0 %v9141_v45  ;;  %v9189_v45 = vld [vmem:[%s11762_s1 + $0x740] sm:$0xff]  }
  0xb4   :  { %8242 = vmatprep.subr.bf16.mxu0 %v9144_v47  ;;  %v9191_v47 = vld [vmem:[%s11762_s1 + $0x700] sm:$0xff]  }
  0xb5   :  { %8263 = vmatpush3.bf16.msra.mxu1 %v9143_v46  ;;  %v513_v46 = vpack.c.bf16 %v186_v44, %v186_v44  ;;  %v9227_v44 = vld [vmem:[%s11762_s1 + $0x848] sm:$0xff]  }
  0xb6   :  { %8264 = vmatprep.subr.bf16.mxu1 %v9146_v48  ;;  %v9192_v48 = vld [vmem:[%s11762_s1 + $0x7c0] sm:$0xff]  }
  0xb7   :  { %8243 = vmatpush3.bf16.msra.mxu0 %v9145_v49  ;;  %v510_v49 = vpack.c.bf16 %v177_v35, %v177_v35  ;;  %v9222_v35 = vld [vmem:[%s11762_s1 + $0x840] sm:$0xff]  }
  0xb8   :  { %8244 = vmatprep.subr.bf16.mxu0 %v9148_v51  ;;  %v9193_v51 = vld [vmem:[%s11762_s1 + $0x780] sm:$0xff]  }
  0xb9   :  { %8265 = vmatpush3.bf16.msra.mxu1 %v9147_v50  ;;  %v512_v50 = vpack.c.bf16 %v184_v39, %v184_v39 }
  0xba   :  { %8266 = vmatprep.subr.bf16.mxu1 %v9150_v52  ;;  %v9194_v52 = vld [vmem:[%s11762_s1 + $0x748] sm:$0xff]  }
  0xbb   :  { %8245 = vmatpush3.bf16.msra.mxu0 %v9149_v53  ;;  %v9196_v53 = vld [vmem:[%s11762_s1 + $0x7c8] sm:$0xff]  }
  0xbc   :  { %8246 = vmatprep.subr.bf16.mxu0 %v9152_v58  ;;  %v9199_v58 = vld [vmem:[%s11762_s1 + $0x710] sm:$0xff]  }
  0xbd   :  { %8267 = vmatpush3.bf16.msra.mxu1 %v9151_v55  ;;  %v9197_v55 = vld [vmem:[%s11762_s1 + $0x788] sm:$0xff]  }
  0xbe   :  { %8268 = vmatprep.subr.bf16.mxu1 %v9154_v59  ;;  %v9201_v59 = vld [vmem:[%s11762_s1 + $0x790] sm:$0xff]  }
  0xbf   :  { %8247 = vmatpush3.bf16.msra.mxu0 %v9153_v62  ;;  %v9203_v62 = vld [vmem:[%s11762_s1 + $0x718] sm:$0xff]  }
  0xc0   :  { %8276 = vmatprep.subr.bf16.mxu0 %v9156_v2  ;;  %v9207_v2 = vld [vmem:[%s11762_s1 + $0x720] sm:$0xff]  }
  0xc1   :  { %8269 = vmatpush3.bf16.msra.mxu1 %v9155_v0  ;;  %v9206_v0 = vld [vmem:[%s11762_s1 + $0x760] sm:$0xff]  }
  0xc2   :  { %8298 = vmatprep.subr.bf16.mxu1 %v9159_v4  ;;  %6009 = vmatmul.mubr.bf16.vlgmr.msra.gmra.mrb[20].mxu0 %v506_v6  ;;  %v9210_v4 = vld [vmem:[%s11762_s1 + $0x768] sm:$0xff]  }
  0xc3   :  { %8277 = vmatpush3.bf16.msra.mxu0 %v9158_v5  ;;  %6088 = vmatprep.mubr.bf16.mxu0 %v511_v42  ;;  %v9212_v5 = vld [vmem:[%s11762_s1 + $0x7e8] sm:$0xff]  }
  0xc4   :  { %6049 = vmatmul.mubr.bf16.vlgmr.msra.gmra.mrb[20].mxu1 %v508_v7  ;;  %8278 = vmatprep.subr.bf16.mxu0 %v9161_v9  ;;  %v9211_v6 = vld [vmem:[%s11762_s1 + $0x728] sm:$0xff]   ;;  %v7379_v9 = vld [vmem:[%s11763_s2] ss:$0 sm:$0xff] }
  0xc5   :  { %8299 = vmatpush3.bf16.msra.mxu1 %v9160_v8  ;;  %6128 = vmatprep.mubr.bf16.mxu1 %v513_v46  ;;  %v9213_v7 = vld [vmem:[%s11762_s1 + $0x7a8] sm:$0xff]   ;;  %v9214_v8 = vld [vmem:[%s11762_s1 + $0x770] sm:$0xff]  }
  0xc6   :  { %8300 = vmatprep.subr.bf16.mxu1 %v9163_v10  ;;  %v9216_v10 = vld [vmem:[%s11762_s1 + $0x7f0] sm:$0xff]   ;;  %v9228_v46 = vld [vmem:[%s11762_s1 + $0x808] sm:$0xff]  }
  0xc7   :  { %8279 = vmatpush3.bf16.msra.mxu0 %v9162_v11 }
  0xc8   :  { %8280 = vmatprep.subr.bf16.mxu0 %v9165_v13  ;;  %v9215_v13 = vld [vmem:[%s11762_s1 + $0x730] sm:$0xff]  }
  0xc9   :  { %8301 = vmatpush3.bf16.msra.mxu1 %v9164_v12 }
  0xca   :  { %8302 = vmatprep.subr.bf16.mxu1 %v9167_v14  ;;  %v9217_v14 = vld [vmem:[%s11762_s1 + $0x7b0] sm:$0xff]  }
  0xcb   :  { %8281 = vmatpush3.bf16.msra.mxu0 %v9166_v15 }
  0xcc   :  { %8282 = vmatprep.subr.bf16.mxu0 %v9169_v17  ;;  %v9218_v17 = vld [vmem:[%s11762_s1 + $0x778] sm:$0xff]  }
  0xcd   :  { %8303 = vmatpush3.bf16.msra.mxu1 %v9168_v16 }
  0xce   :  { %8304 = vmatprep.subr.bf16.mxu1 %v9171_v18 }
  0xcf   :  { %8283 = vmatpush3.bf16.msra.mxu0 %v9170_v19 }
  0xd0   :  { %8284 = vmatprep.subr.bf16.mxu0 %v9173_v21  ;;  %v35_v21 = vld [vmem:[%s11761_s0 + $0x38] sm:$0xff] }
  0xd1   :  { %8305 = vmatpush3.bf16.msra.mxu1 %v9172_v20 }
  0xd2   :  { %8306 = vmatprep.subr.bf16.mxu1 %v9175_v22 }
  0xd3   :  { %8285 = vmatpush3.bf16.msra.mxu0 %v9174_v23  ;;  %v9220_v23 = vld [vmem:[%s11762_s1 + $0x7f8] sm:$0xff]  }
  0xd4   :  { %8286 = vmatprep.subr.bf16.mxu0 %v9177_v25  ;;  %v187_v25 = vcombine.high %v35_v21, %v35_v21 }
  0xd5   :  { %8307 = vmatpush3.bf16.msra.mxu1 %v9176_v24  ;;  %v194_v24 = vrot.slane %v35_v21, %v9779_v41 }
  0xd6   :  { %8308 = vmatprep.subr.bf16.mxu1 %v9179_v26 }
  0xd7   :  { %8287 = vmatpush3.bf16.msra.mxu0 %v9178_v27  ;;  %v514_v39 = vpack.c.bf16 %v194_v24, %v194_v24 }
  0xd8   :  { %8288 = vmatprep.subr.bf16.mxu0 %v9181_v29  ;;  %v202_v29 = vcombine.high %v194_v24, %v194_v24  ;;  %v9254_v24 = vld [vmem:[%s11762_s1 + $0x8b8] sm:$0xff]  }
  0xd9   :  { %8309 = vmatpush3.bf16.msra.mxu1 %v9180_v28  ;;  %v9219_v28 = vld [vmem:[%s11762_s1 + $0x738] sm:$0xff]  }
  0xda   :  { %8310 = vmatprep.subr.bf16.mxu1 %v9183_v30  ;;  %v201_v30 = vrot.slane %v187_v25, %v9779_v41 }
  0xdb   :  { %8289 = vmatpush3.bf16.msra.mxu0 %v9182_v31 }
  0xdc   :  { %8290 = vmatprep.subr.bf16.mxu0 %v9185_v34  ;;  %v515_v34 = vpack.c.bf16 %v202_v29, %v202_v29  ;;  %v203_v36 = vcombine.high %v201_v30, %v201_v30  ;;  %v516_v42 = vpack.c.bf16 %v201_v30, %v201_v30  ;;  %v9258_v29 = vld [vmem:[%s11762_s1 + $0x9c0] sm:$0xff]  }
  0xdd   :  { %8311 = vmatpush3.bf16.msra.mxu1 %v9184_v32 }
  0xde   :  { %8312 = vmatprep.subr.bf16.mxu1 %v9187_v37  ;;  %v9224_v37 = vld [vmem:[%s11762_s1 + $0x800] sm:$0xff]  }
  0xdf   :  { %8291 = vmatpush3.bf16.msra.mxu0 %v9186_v40  ;;  %v517_v40 = vpack.c.bf16 %v203_v36, %v203_v36  ;;  %v9261_v36 = vld [vmem:[%s11762_s1 + $0x908] sm:$0xff]  }
  0xe0   :  { %8320 = vmatprep.subr.bf16.mxu0 %v9189_v45  ;;  %v9229_v45 = vld [vmem:[%s11762_s1 + $0x8c8] sm:$0xff]  }
  0xe1   :  { %8313 = vmatpush3.bf16.msra.mxu1 %v9188_v43  ;;  %v9226_v43 = vld [vmem:[%s11762_s1 + $0x880] sm:$0xff]  }
  0xe2   :  { %8342 = vmatprep.subr.bf16.mxu1 %v9192_v48  ;;  %6089 = vmatmul.mubr.bf16.vlgmr.msra.gmra.mrb[24].mxu0 %v510_v49  ;;  %v9231_v48 = vld [vmem:[%s11762_s1 + $0x850] sm:$0xff]  }
  0xe3   :  { %8321 = vmatpush3.bf16.msra.mxu0 %v9191_v47  ;;  %6168 = vmatprep.mubr.bf16.mxu0 %v515_v34  ;;  %v9230_v47 = vld [vmem:[%s11762_s1 + $0x888] sm:$0xff]   ;;  %v9233_v49 = vld [vmem:[%s11762_s1 + $0x8d0] sm:$0xff]  }
  0xe4   :  { %6129 = vmatmul.mubr.bf16.vlgmr.msra.gmra.mrb[24].mxu1 %v512_v50  ;;  %8322 = vmatprep.subr.bf16.mxu0 %v9194_v52  ;;  %v9232_v50 = vld [vmem:[%s11762_s1 + $0x810] sm:$0xff]   ;;  %v9235_v52 = vld [vmem:[%s11762_s1 + $0x858] sm:$0xff]   ;;  %v9260_v34 = vld [vmem:[%s11762_s1 + $0x948] sm:$0xff]  }
  0xe5   :  { %8343 = vmatpush3.bf16.msra.mxu1 %v9193_v51  ;;  %6208 = vmatprep.mubr.bf16.mxu1 %v517_v40  ;;  %v9234_v51 = vld [vmem:[%s11762_s1 + $0x890] sm:$0xff]  }
  0xe6   :  { %8344 = vmatprep.subr.bf16.mxu1 %v9196_v53  ;;  %v9237_v53 = vld [vmem:[%s11762_s1 + $0x8d8] sm:$0xff]   ;;  %v9265_v40 = vld [vmem:[%s11762_s1 + $0x910] sm:$0xff]  }
  0xe7   :  { %8323 = vmatpush3.bf16.msra.mxu0 %v9195_v54  ;;  %v9236_v54 = vld [vmem:[%s11762_s1 + $0x818] sm:$0xff]  }
  0xe8   :  { %8324 = vmatprep.subr.bf16.mxu0 %v9198_v56  ;;  %v9239_v56 = vld [vmem:[%s11762_s1 + $0x860] sm:$0xff]  }
  0xe9   :  { %8345 = vmatpush3.bf16.msra.mxu1 %v9197_v55  ;;  %v9238_v55 = vld [vmem:[%s11762_s1 + $0x898] sm:$0xff]  }
  0xea   :  { %8346 = vmatprep.subr.bf16.mxu1 %v9200_v57  ;;  %v9241_v57 = vld [vmem:[%s11762_s1 + $0x8e0] sm:$0xff]  }
  0xeb   :  { %8325 = vmatpush3.bf16.msra.mxu0 %v9199_v58  ;;  %v9240_v58 = vld [vmem:[%s11762_s1 + $0x820] sm:$0xff]  }
  0xec   :  { %8326 = vmatprep.subr.bf16.mxu0 %v9202_v60  ;;  %v9243_v60 = vld [vmem:[%s11762_s1 + $0x868] sm:$0xff]  }
  0xed   :  { %8347 = vmatpush3.bf16.msra.mxu1 %v9201_v59  ;;  %v9242_v59 = vld [vmem:[%s11762_s1 + $0x8a0] sm:$0xff]  }
  0xee   :  { %8348 = vmatprep.subr.bf16.mxu1 %v9204_v61  ;;  %v9245_v61 = vld [vmem:[%s11762_s1 + $0x8e8] sm:$0xff]  }
  0xef   :  { %8327 = vmatpush3.bf16.msra.mxu0 %v9203_v62  ;;  %v9244_v62 = vld [vmem:[%s11762_s1 + $0x828] sm:$0xff]  }
  0xf0   :  { %8328 = vmatprep.subr.bf16.mxu0 %v9206_v0  ;;  %v9247_v0 = vld [vmem:[%s11762_s1 + $0x870] sm:$0xff]  }
  0xf1   :  { %8349 = vmatpush3.bf16.msra.mxu1 %v9205_v63  ;;  %v9246_v63 = vld [vmem:[%s11762_s1 + $0x8a8] sm:$0xff]  }
  0xf2   :  { %8350 = vmatprep.subr.bf16.mxu1 %v9208_v1  ;;  %v9249_v1 = vld [vmem:[%s11762_s1 + $0x8f0] sm:$0xff]  }
  0xf3   :  { %8329 = vmatpush3.bf16.msra.mxu0 %v9207_v2 }
  0xf4   :  { %8330 = vmatprep.subr.bf16.mxu0 %v9210_v4  ;;  %v9248_v4 = vld [vmem:[%s11762_s1 + $0x830] sm:$0xff]  }
  0xf5   :  { %8351 = vmatpush3.bf16.msra.mxu1 %v9209_v3  ;;  %v8028_v11 = vpop.f32.mrb[0].mxu0 }
  0xf6   :  { %8352 = vmatprep.subr.bf16.mxu1 %v9212_v5  ;;  %v8029_v15 = vpop.f32.mrb[1].mxu0  ;;  %v9250_v5 = vld [vmem:[%s11762_s1 + $0x8b0] sm:$0xff]  }
  0xf7   :  { %v8050_v12 = vpop.f32.mrb[0].mxu1  ;;  %v8030_v18 = vadd.f32 %v8029_v15, %v8028_v11  ;;  %v8031_v19 = vpop.f32.mrb[2].mxu0  ;;  %8331 = vmatpush3.bf16.msra.mxu0 %v9211_v6  ;;  %v9251_v11 = vld [vmem:[%s11762_s1 + $0x878] sm:$0xff]  }
  0xf8   :  { %v8051_v16 = vpop.f32.mrb[1].mxu1  ;;  %v8032_v22 = vpop.f32.mrb[3].mxu0  ;;  %8332 = vmatprep.subr.bf16.mxu0 %v9214_v8  ;;  %v9253_v15 = vld [vmem:[%s11762_s1 + $0x8f8] sm:$0xff]  }
  0xf9   :  { %v8052_v20 = vadd.f32 %v8051_v16, %v8050_v12  ;;  %8353 = vmatpush3.bf16.msra.mxu1 %v9213_v7  ;;  %v5611_v26 = vadd.f32 %v8030_v18, %v7379_v9  ;;  %v8053_v27 = vpop.f32.mrb[2].mxu1  ;;  %v36_v12 = vld [vmem:[%s11761_s0 + $0x40] sm:$0xff] }
  0xfa   :  { %8354 = vmatprep.subr.bf16.mxu1 %v9216_v10  ;;  %v8054_v31 = vpop.f32.mrb[3].mxu1  ;;  %v211_v16 = vrot.slane %v36_v12, %v9779_v41 }
  0xfb   :  { %v10484_v32 = vadd.f32 %v8052_v20, %v5611_v26  ;;  %8333 = vmatpush3.bf16.msra.mxu0 %v9215_v13  ;;  %v9252_v20 = vld [vmem:[%s11762_s1 + $0x838] sm:$0xff]   ;;  %v9255_v26 = vld [vmem:[%s11762_s1 + $0x940] sm:$0xff]  }
  0xfc   :  { %8334 = vmatprep.subr.bf16.mxu0 %v9218_v17  ;;  %v204_v17 = vcombine.high %v36_v12, %v36_v12  ;;  %v219_v21 = vcombine.high %v211_v16, %v211_v16  ;;  %v518_v30 = vpack.c.bf16 %v211_v16, %v211_v16 }
  0xfd   :  { %8355 = vmatpush3.bf16.msra.mxu1 %v9217_v14 }
  0xfe   :  { %8356 = vmatprep.subr.bf16.mxu1 %v9220_v23  ;;  %v218_v22 = vrot.slane %v204_v17, %v9779_v41  ;;  %v519_v25 = vpack.c.bf16 %v219_v21, %v219_v21  ;;  %v9290_v21 = vld [vmem:[%s11762_s1 + $0xa00] sm:$0xff]  }
  0xff   :  { %8335 = vmatpush3.bf16.msra.mxu0 %v9219_v28  ;;  %v9257_v28 = vld [vmem:[%s11762_s1 + $0x900] sm:$0xff]  }
 0x100   :  { %8364 = vmatprep.subr.bf16.mxu0 %v9222_v35  ;;  %v220_v27 = vcombine.high %v218_v22, %v218_v22  ;;  %v9262_v35 = vld [vmem:[%s11762_s1 + $0x9c8] sm:$0xff]  }
 0x101   :  { %8357 = vmatpush3.bf16.msra.mxu1 %v9221_v33  ;;  %v9259_v33 = vld [vmem:[%s11762_s1 + $0x980] sm:$0xff]  }
 0x102   :  { %8386 = vmatprep.subr.bf16.mxu1 %v9225_v38  ;;  %6169 = vmatmul.mubr.bf16.vlgmr.msra.gmra.mrb[28].mxu0 %v514_v39  ;;  %v521_v31 = vpack.c.bf16 %v220_v27, %v220_v27  ;;  %v9264_v38 = vld [vmem:[%s11762_s1 + $0x950] sm:$0xff]   ;;  %v9294_v27 = vld [vmem:[%s11762_s1 + $0xa08] sm:$0xff]  }
 0x103   :  { %8365 = vmatpush3.bf16.msra.mxu0 %v9224_v37  ;;  %6248 = vmatprep.mubr.bf16.mxu0 %v519_v25  ;;  %v9263_v37 = vld [vmem:[%s11762_s1 + $0x988] sm:$0xff]   ;;  %v9266_v39 = vld [vmem:[%s11762_s1 + $0x9d0] sm:$0xff]  }
 0x104   :  { %6209 = vmatmul.mubr.bf16.vlgmr.msra.gmra.mrb[28].mxu1 %v516_v42  ;;  %8366 = vmatprep.subr.bf16.mxu0 %v9227_v44  ;;  %v9267_v42 = vld [vmem:[%s11762_s1 + $0x990] sm:$0xff]   ;;  %v9270_v44 = vld [vmem:[%s11762_s1 + $0x9d8] sm:$0xff]   ;;  %v9293_v25 = vld [vmem:[%s11762_s1 + $0xa48] sm:$0xff]  }
 0x105   :  { %8387 = vmatpush3.bf16.msra.mxu1 %v9226_v43  ;;  %6288 = vmatprep.mubr.bf16.mxu1 %v521_v31  ;;  %v9268_v43 = vld [vmem:[%s11762_s1 + $0x958] sm:$0xff]   ;;  %v9298_v31 = vld [vmem:[%s11762_s1 + $0xa10] sm:$0xff]  }
 0x106   :  { %8388 = vmatprep.subr.bf16.mxu1 %v9229_v45  ;;  %v9269_v45 = vld [vmem:[%s11762_s1 + $0x918] sm:$0xff]  }
 0x107   :  { %8367 = vmatpush3.bf16.msra.mxu0 %v9228_v46  ;;  %v9271_v46 = vld [vmem:[%s11762_s1 + $0x998] sm:$0xff]  }
 0x108   :  { %8368 = vmatprep.subr.bf16.mxu0 %v9231_v48  ;;  %v9274_v48 = vld [vmem:[%s11762_s1 + $0x9e0] sm:$0xff]  }
 0x109   :  { %8389 = vmatpush3.bf16.msra.mxu1 %v9230_v47  ;;  %v9272_v47 = vld [vmem:[%s11762_s1 + $0x960] sm:$0xff]  }
 0x10a   :  { %8390 = vmatprep.subr.bf16.mxu1 %v9233_v49  ;;  %v9273_v49 = vld [vmem:[%s11762_s1 + $0x920] sm:$0xff]  }
 0x10b   :  { %8369 = vmatpush3.bf16.msra.mxu0 %v9232_v50  ;;  %v9275_v50 = vld [vmem:[%s11762_s1 + $0x9a0] sm:$0xff]  }
 0x10c   :  { %8370 = vmatprep.subr.bf16.mxu0 %v9235_v52  ;;  %v9278_v52 = vld [vmem:[%s11762_s1 + $0x9e8] sm:$0xff]  }
 0x10d   :  { %8391 = vmatpush3.bf16.msra.mxu1 %v9234_v51  ;;  %v9276_v51 = vld [vmem:[%s11762_s1 + $0x968] sm:$0xff]  }
 0x10e   :  { %8392 = vmatprep.subr.bf16.mxu1 %v9237_v53  ;;  %v9277_v53 = vld [vmem:[%s11762_s1 + $0x928] sm:$0xff]  }
 0x10f   :  { %8371 = vmatpush3.bf16.msra.mxu0 %v9236_v54  ;;  %v9279_v54 = vld [vmem:[%s11762_s1 + $0x9a8] sm:$0xff]  }
 0x110   :  { %8372 = vmatprep.subr.bf16.mxu0 %v9239_v56  ;;  %v9282_v56 = vld [vmem:[%s11762_s1 + $0x9f0] sm:$0xff]  }
 0x111   :  { %8393 = vmatpush3.bf16.msra.mxu1 %v9238_v55  ;;  %v9280_v55 = vld [vmem:[%s11762_s1 + $0x970] sm:$0xff]  }
 0x112   :  { %8394 = vmatprep.subr.bf16.mxu1 %v9241_v57 }
 0x113   :  { %8373 = vmatpush3.bf16.msra.mxu0 %v9240_v58 }
 0x114   :  { %8374 = vmatprep.subr.bf16.mxu0 %v9243_v60 }
 0x115   :  { %8395 = vmatpush3.bf16.msra.mxu1 %v9242_v59  ;;  %v8072_v2 = vpop.f32.mrb[4].mxu0  ;;  %v9281_v59 = vld [vmem:[%s11762_s1 + $0x930] sm:$0xff]  }
 0x116   :  { %8396 = vmatprep.subr.bf16.mxu1 %v9245_v61  ;;  %v8073_v6 = vpop.f32.mrb[5].mxu0 }
 0x117   :  { %v8094_v3 = vpop.f32.mrb[4].mxu1  ;;  %v8074_v8 = vadd.f32 %v8073_v6, %v8072_v2  ;;  %v8075_v9 = vpop.f32.mrb[6].mxu0  ;;  %8375 = vmatpush3.bf16.msra.mxu0 %v9244_v62  ;;  %v9283_v62 = vld [vmem:[%s11762_s1 + $0x9b0] sm:$0xff]  }
 0x118   :  { %v8095_v7 = vpop.f32.mrb[5].mxu1  ;;  %v8076_v14 = vpop.f32.mrb[7].mxu0  ;;  %8376 = vmatprep.subr.bf16.mxu0 %v9247_v0 }
 0x119   :  { %v8096_v10 = vadd.f32 %v8095_v7, %v8094_v3  ;;  %8397 = vmatpush3.bf16.msra.mxu1 %v9246_v63  ;;  %v8097_v13 = vpop.f32.mrb[6].mxu1  ;;  %v5691_v18 = vadd.f32 %v8074_v8, %v10484_v32  ;;  %v520_v32 = vpack.c.bf16 %v218_v22, %v218_v22  ;;  %v9284_v63 = vld [vmem:[%s11762_s1 + $0x978] sm:$0xff]  }
 0x11a   :  { %8398 = vmatprep.subr.bf16.mxu1 %v9249_v1  ;;  %v8098_v19 = vpop.f32.mrb[7].mxu1  ;;  %v9286_v3 = vld [vmem:[%s11762_s1 + $0x9f8] sm:$0xff]  }
 0x11b   :  { %v10588_v23 = vadd.f32 %v8096_v10, %v5691_v18  ;;  %8377 = vmatpush3.bf16.msra.mxu0 %v9248_v4  ;;  %v9285_v10 = vld [vmem:[%s11762_s1 + $0x938] sm:$0xff]   ;;  %v9291_v18 = vld [vmem:[%s11762_s1 + $0xac0] sm:$0xff]  }
 0x11c   :  { %8378 = vmatprep.subr.bf16.mxu0 %v9251_v11  ;;  %v9287_v14 = vld [vmem:[%s11762_s1 + $0x9b8] sm:$0xff]  }
 0x11d   :  { %8399 = vmatpush3.bf16.msra.mxu1 %v9250_v5  ;;  %v37_v5 = vld [vmem:[%s11761_s0 + $0x48] sm:$0xff] }
 0x11e   :  { %8400 = vmatprep.subr.bf16.mxu1 %v9253_v15  ;;  %v228_v7 = vrot.slane %v37_v5, %v9779_v41  ;;  %v221_v8 = vcombine.high %v37_v5, %v37_v5  ;;  %v9288_v15 = vld [vmem:[%s11762_s1 + $0xa40] sm:$0xff]  }
 0x11f   :  { %8379 = vmatpush3.bf16.msra.mxu0 %v9252_v20 }
 0x120   :  { %8408 = vmatprep.subr.bf16.mxu0 %v9255_v26  ;;  %v236_v13 = vcombine.high %v228_v7, %v228_v7  ;;  %v235_v16 = vrot.slane %v221_v8, %v9779_v41  ;;  %v522_v19 = vpack.c.bf16 %v228_v7, %v228_v7  ;;  %v9295_v26 = vld [vmem:[%s11762_s1 + $0xac8] sm:$0xff]   ;;  %v9324_v8 = vld [vmem:[%s11762_s1 + $0xbc0] sm:$0xff]  }
 0x121   :  { %8401 = vmatpush3.bf16.msra.mxu1 %v9254_v24 }
 0x122   :  { %8430 = vmatprep.subr.bf16.mxu1 %v9258_v29  ;;  %6249 = vmatmul.mubr.bf16.vlgmr.msra.gmra.mrb[32].mxu0 %v518_v30  ;;  %v523_v17 = vpack.c.bf16 %v236_v13, %v236_v13  ;;  %v237_v20 = vcombine.high %v235_v16, %v235_v16  ;;  %v524_v22 = vpack.c.bf16 %v235_v16, %v235_v16  ;;  %v9297_v29 = vld [vmem:[%s11762_s1 + $0xa50] sm:$0xff]   ;;  %v9326_v16 = vld [vmem:[%s11762_s1 + $0xb48] sm:$0xff]  }
 0x123   :  { %8409 = vmatpush3.bf16.msra.mxu0 %v9257_v28  ;;  %v9296_v28 = vld [vmem:[%s11762_s1 + $0xa88] sm:$0xff]   ;;  %v9299_v30 = vld [vmem:[%s11762_s1 + $0xad0] sm:$0xff]  }
 0x124   :  { %6289 = vmatmul.mubr.bf16.vlgmr.msra.gmra.mrb[32].mxu1 %v520_v32  ;;  %8410 = vmatprep.subr.bf16.mxu0 %v9260_v34  ;;  %v525_v24 = vpack.c.bf16 %v237_v20, %v237_v20  ;;  %v9300_v32 = vld [vmem:[%s11762_s1 + $0xa90] sm:$0xff]   ;;  %v9303_v34 = vld [vmem:[%s11762_s1 + $0xad8] sm:$0xff]  }
 0x125   :  { %8431 = vmatpush3.bf16.msra.mxu1 %v9259_v33  ;;  %6328 = vmatprep.mubr.bf16.mxu0 %v523_v17  ;;  %v9301_v33 = vld [vmem:[%s11762_s1 + $0xa58] sm:$0xff]   ;;  %v9328_v17 = vld [vmem:[%s11762_s1 + $0xbc8] sm:$0xff]   ;;  %v9330_v20 = vld [vmem:[%s11762_s1 + $0xb50] sm:$0xff]  }
 0x126   :  { %8432 = vmatprep.subr.bf16.mxu1 %v9262_v35  ;;  %6368 = vmatprep.mubr.bf16.mxu1 %v525_v24  ;;  %v9302_v35 = vld [vmem:[%s11762_s1 + $0xa18] sm:$0xff]  }
 0x127   :  { %8411 = vmatpush3.bf16.msra.mxu0 %v9261_v36  ;;  %v9304_v36 = vld [vmem:[%s11762_s1 + $0xa98] sm:$0xff]  }
 0x128   :  { %8412 = vmatprep.subr.bf16.mxu0 %v9264_v38  ;;  %v9307_v38 = vld [vmem:[%s11762_s1 + $0xae0] sm:$0xff]   ;;  %v9334_v24 = vld [vmem:[%s11762_s1 + $0xb58] sm:$0xff]  }
 0x129   :  { %8433 = vmatpush3.bf16.msra.mxu1 %v9263_v37  ;;  %v9305_v37 = vld [vmem:[%s11762_s1 + $0xa60] sm:$0xff]  }
 0x12a   :  { %8434 = vmatprep.subr.bf16.mxu1 %v9266_v39  ;;  %v9306_v39 = vld [vmem:[%s11762_s1 + $0xa20] sm:$0xff]  }
 0x12b   :  { %8413 = vmatpush3.bf16.msra.mxu0 %v9265_v40  ;;  %v9308_v40 = vld [vmem:[%s11762_s1 + $0xaa0] sm:$0xff]  }
 0x12c   :  { %8414 = vmatprep.subr.bf16.mxu0 %v9268_v43  ;;  %v9311_v43 = vld [vmem:[%s11762_s1 + $0xae8] sm:$0xff]  }
 0x12d   :  { %8435 = vmatpush3.bf16.msra.mxu1 %v9267_v42  ;;  %v9309_v42 = vld [vmem:[%s11762_s1 + $0xa68] sm:$0xff]  }
 0x12e   :  { %8436 = vmatprep.subr.bf16.mxu1 %v9270_v44  ;;  %v9310_v44 = vld [vmem:[%s11762_s1 + $0xa28] sm:$0xff]  }
 0x12f   :  { %8415 = vmatpush3.bf16.msra.mxu0 %v9269_v45  ;;  %v9312_v45 = vld [vmem:[%s11762_s1 + $0xaa8] sm:$0xff]  }
 0x130   :  { %8416 = vmatprep.subr.bf16.mxu0 %v9272_v47 }
 0x131   :  { %8437 = vmatpush3.bf16.msra.mxu1 %v9271_v46  ;;  %v9313_v46 = vld [vmem:[%s11762_s1 + $0xa70] sm:$0xff]  }
 0x132   :  { %8438 = vmatprep.subr.bf16.mxu1 %v9274_v48 }
 0x133   :  { %8417 = vmatpush3.bf16.msra.mxu0 %v9273_v49  ;;  %v9314_v49 = vld [vmem:[%s11762_s1 + $0xa30] sm:$0xff]  }
 0x134   :  { %8418 = vmatprep.subr.bf16.mxu0 %v9276_v51 }
 0x135   :  { %8439 = vmatpush3.bf16.msra.mxu1 %v9275_v50  ;;  %v8116_v57 = vpop.f32.mrb[8].mxu0  ;;  %v9315_v50 = vld [vmem:[%s11762_s1 + $0xaf0] sm:$0xff]  }
 0x136   :  { %8440 = vmatprep.subr.bf16.mxu1 %v9278_v52  ;;  %v8117_v60 = vpop.f32.mrb[9].mxu0 }
 0x137   :  { %v8138_v58 = vpop.f32.mrb[8].mxu1  ;;  %v8118_v0 = vadd.f32 %v8117_v60, %v8116_v57  ;;  %v8119_v1 = vpop.f32.mrb[10].mxu0  ;;  %8419 = vmatpush3.bf16.msra.mxu0 %v9277_v53  ;;  %v9316_v53 = vld [vmem:[%s11762_s1 + $0xab0] sm:$0xff]   ;;  %v9317_v57 = vld [vmem:[%s11762_s1 + $0xa78] sm:$0xff]  }
 0x138   :  { %v8139_v61 = vpop.f32.mrb[9].mxu1  ;;  %v8120_v4 = vpop.f32.mrb[11].mxu0  ;;  %8420 = vmatprep.subr.bf16.mxu0 %v9280_v55 }
 0x139   :  { %v8140_v2 = vadd.f32 %v8139_v61, %v8138_v58  ;;  %8441 = vmatpush3.bf16.msra.mxu1 %v9279_v54  ;;  %v5771_v6 = vadd.f32 %v8118_v0, %v10588_v23  ;;  %v8141_v9 = vpop.f32.mrb[10].mxu1  ;;  %v9292_v23 = vld [vmem:[%s11762_s1 + $0xa80] sm:$0xff]   ;;  %v38_v61 = vld [vmem:[%s11761_s0 + $0x50] sm:$0xff]  ;;  %v9320_v4 = vld [vmem:[%s11762_s1 + $0xab8] sm:$0xff]  }
 0x13a   :  { %8442 = vmatprep.subr.bf16.mxu1 %v9282_v56  ;;  %v8142_v11 = vpop.f32.mrb[11].mxu1  ;;  %v245_v0 = vrot.slane %v38_v61, %v9779_v41  ;;  %v238_v1 = vcombine.high %v38_v61, %v38_v61  ;;  %v9354_v61 = vld [vmem:[%s11762_s1 + $0xc40] sm:$0xff]  }
 0x13b   :  { %v10691_v12 = vadd.f32 %v8140_v2, %v5771_v6  ;;  %8421 = vmatpush3.bf16.msra.mxu0 %v9281_v59  ;;  %v9319_v59 = vld [vmem:[%s11762_s1 + $0xaf8] sm:$0xff]   ;;  %v9321_v6 = vld [vmem:[%s11762_s1 + $0xb40] sm:$0xff]  }
 0x13c   :  { %8422 = vmatprep.subr.bf16.mxu0 %v9284_v63  ;;  %v9318_v63 = vld [vmem:[%s11762_s1 + $0xa38] sm:$0xff]   ;;  %v253_v5 = vcombine.high %v245_v0, %v245_v0  ;;  %v252_v7 = vrot.slane %v238_v1, %v9779_v41 }
 0x13d   :  { %8443 = vmatpush3.bf16.msra.mxu1 %v9283_v62 }
 0x13e   :  { %8444 = vmatprep.subr.bf16.mxu1 %v9286_v3  ;;  %v527_v9 = vpack.c.bf16 %v253_v5, %v253_v5  ;;  %v254_v11 = vcombine.high %v252_v7, %v252_v7  ;;  %v528_v13 = vpack.c.bf16 %v252_v7, %v252_v7  ;;  %v9358_v5 = vld [vmem:[%s11762_s1 + $0xc80] sm:$0xff]   ;;  %v9359_v7 = vld [vmem:[%s11762_s1 + $0xc48] sm:$0xff]  }
 0x13f   :  { %8423 = vmatpush3.bf16.msra.mxu0 %v9285_v10  ;;  %v526_v10 = vpack.c.bf16 %v245_v0, %v245_v0 }
 0x140   :  { %8452 = vmatprep.subr.bf16.mxu0 %v9288_v15  ;;  %v529_v15 = vpack.c.bf16 %v254_v11, %v254_v11  ;;  %v9363_v11 = vld [vmem:[%s11762_s1 + $0xc50] sm:$0xff]  }
 0x141   :  { %8445 = vmatpush3.bf16.msra.mxu1 %v9287_v14  ;;  %v9325_v14 = vld [vmem:[%s11762_s1 + $0xb80] sm:$0xff]  }
 0x142   :  { %8474 = vmatprep.subr.bf16.mxu1 %v9291_v18  ;;  %6329 = vmatmul.mubr.bf16.vlgmr.msra.gmra.mrb[36].mxu0 %v522_v19  ;;  %v9327_v18 = vld [vmem:[%s11762_s1 + $0xb08] sm:$0xff]  }
 0x143   :  { %8453 = vmatpush3.bf16.msra.mxu0 %v9290_v21  ;;  %6408 = vmatprep.mubr.bf16.mxu0 %v527_v9  ;;  %v9329_v19 = vld [vmem:[%s11762_s1 + $0xb88] sm:$0xff]   ;;  %v9332_v21 = vld [vmem:[%s11762_s1 + $0xbd0] sm:$0xff]  }
 0x144   :  { %6369 = vmatmul.mubr.bf16.vlgmr.msra.gmra.mrb[36].mxu1 %v524_v22  ;;  %8454 = vmatprep.subr.bf16.mxu0 %v9293_v25  ;;  %v9331_v22 = vld [vmem:[%s11762_s1 + $0xb10] sm:$0xff]   ;;  %v9336_v25 = vld [vmem:[%s11762_s1 + $0xbd8] sm:$0xff]   ;;  %v9360_v9 = vld [vmem:[%s11762_s1 + $0xc08] sm:$0xff]  }
 0x145   :  { %8475 = vmatpush3.bf16.msra.mxu1 %v9292_v23  ;;  %6448 = vmatprep.mubr.bf16.mxu1 %v529_v15  ;;  %v9333_v23 = vld [vmem:[%s11762_s1 + $0xb90] sm:$0xff]   ;;  %v9367_v15 = vld [vmem:[%s11762_s1 + $0xc58] sm:$0xff]  }
 0x146   :  { %8476 = vmatprep.subr.bf16.mxu1 %v9295_v26  ;;  %v9335_v26 = vld [vmem:[%s11762_s1 + $0xb18] sm:$0xff]  }
 0x147   :  { %8455 = vmatpush3.bf16.msra.mxu0 %v9294_v27  ;;  %v9337_v27 = vld [vmem:[%s11762_s1 + $0xb98] sm:$0xff]  }
 0x148   :  { %8456 = vmatprep.subr.bf16.mxu0 %v9297_v29  ;;  %v9340_v29 = vld [vmem:[%s11762_s1 + $0xbe0] sm:$0xff]  }
 0x149   :  { %8477 = vmatpush3.bf16.msra.mxu1 %v9296_v28  ;;  %v9338_v28 = vld [vmem:[%s11762_s1 + $0xb60] sm:$0xff]  }
 0x14a   :  { %8478 = vmatprep.subr.bf16.mxu1 %v9299_v30  ;;  %v9339_v30 = vld [vmem:[%s11762_s1 + $0xb20] sm:$0xff]  }
 0x14b   :  { %8457 = vmatpush3.bf16.msra.mxu0 %v9298_v31  ;;  %v9341_v31 = vld [vmem:[%s11762_s1 + $0xba0] sm:$0xff]  }
 0x14c   :  { %8458 = vmatprep.subr.bf16.mxu0 %v9301_v33  ;;  %v9344_v33 = vld [vmem:[%s11762_s1 + $0xbe8] sm:$0xff]  }
 0x14d   :  { %8479 = vmatpush3.bf16.msra.mxu1 %v9300_v32  ;;  %v9342_v32 = vld [vmem:[%s11762_s1 + $0xb68] sm:$0xff]  }
 0x14e   :  { %8480 = vmatprep.subr.bf16.mxu1 %v9303_v34  ;;  %v9343_v34 = vld [vmem:[%s11762_s1 + $0xb28] sm:$0xff]  }
 0x14f   :  { %8459 = vmatpush3.bf16.msra.mxu0 %v9302_v35  ;;  %v9345_v35 = vld [vmem:[%s11762_s1 + $0xba8] sm:$0xff]  }
 0x150   :  { %8460 = vmatprep.subr.bf16.mxu0 %v9305_v37 }
 0x151   :  { %8481 = vmatpush3.bf16.msra.mxu1 %v9304_v36  ;;  %v9346_v36 = vld [vmem:[%s11762_s1 + $0xb70] sm:$0xff]  }
 0x152   :  { %8482 = vmatprep.subr.bf16.mxu1 %v9307_v38 }
 0x153   :  { %8461 = vmatpush3.bf16.msra.mxu0 %v9306_v39  ;;  %v9347_v39 = vld [vmem:[%s11762_s1 + $0xb30] sm:$0xff]  }
 0x154   :  { %8462 = vmatprep.subr.bf16.mxu0 %v9309_v42 }
 0x155   :  { %8483 = vmatpush3.bf16.msra.mxu1 %v9308_v40  ;;  %v8160_v47 = vpop.f32.mrb[12].mxu0  ;;  %v9348_v40 = vld [vmem:[%s11762_s1 + $0xbf0] sm:$0xff]  }
 0x156   :  { %8484 = vmatprep.subr.bf16.mxu1 %v9311_v43  ;;  %v8161_v51 = vpop.f32.mrb[13].mxu0 }
 0x157   :  { %v8182_v48 = vpop.f32.mrb[12].mxu1  ;;  %v8162_v54 = vadd.f32 %v8161_v51, %v8160_v47  ;;  %v8163_v55 = vpop.f32.mrb[14].mxu0  ;;  %8463 = vmatpush3.bf16.msra.mxu0 %v9310_v44  ;;  %v9349_v47 = vld [vmem:[%s11762_s1 + $0xbb0] sm:$0xff]   ;;  %v9352_v51 = vld [vmem:[%s11762_s1 + $0xbf8] sm:$0xff]  }
 0x158   :  { %v8183_v52 = vpop.f32.mrb[13].mxu1  ;;  %v8164_v58 = vpop.f32.mrb[15].mxu0  ;;  %8464 = vmatprep.subr.bf16.mxu0 %v9313_v46 }
 0x159   :  { %v8184_v56 = vadd.f32 %v8183_v52, %v8182_v48  ;;  %8485 = vmatpush3.bf16.msra.mxu1 %v9312_v45  ;;  %v5851_v60 = vadd.f32 %v8162_v54, %v10691_v12  ;;  %v8185_v62 = vpop.f32.mrb[14].mxu1  ;;  %v9323_v12 = vld [vmem:[%s11762_s1 + $0xb00] sm:$0xff]   ;;  %v39_v52 = vld [vmem:[%s11761_s0 + $0x58] sm:$0xff] }
 0x15a   :  { %8486 = vmatprep.subr.bf16.mxu1 %v9315_v50  ;;  %v8186_v2 = vpop.f32.mrb[15].mxu1  ;;  %v9351_v54 = vld [vmem:[%s11762_s1 + $0xb38] sm:$0xff]   ;;  %v262_v55 = vrot.slane %v39_v52, %v9779_v41 }
 0x15b   :  { %v10795_v3 = vadd.f32 %v8184_v56, %v5851_v60  ;;  %8465 = vmatpush3.bf16.msra.mxu0 %v9314_v49  ;;  %v9350_v49 = vld [vmem:[%s11762_s1 + $0xb78] sm:$0xff]   ;;  %v255_v56 = vcombine.high %v39_v52, %v39_v52 }
 0x15c   :  { %8466 = vmatprep.subr.bf16.mxu0 %v9317_v57  ;;  %v270_v60 = vcombine.high %v262_v55, %v262_v55  ;;  %v530_v1 = vpack.c.bf16 %v262_v55, %v262_v55 }
 0x15d   :  { %8487 = vmatpush3.bf16.msra.mxu1 %v9316_v53  ;;  %v269_v62 = vrot.slane %v255_v56, %v9779_v41  ;;  %v9390_v56 = vld [vmem:[%s11762_s1 + $0xdc0] sm:$0xff]  }
 0x15e   :  { %8488 = vmatprep.subr.bf16.mxu1 %v9319_v59  ;;  %v9353_v59 = vld [vmem:[%s11762_s1 + $0xbb8] sm:$0xff]   ;;  %v531_v0 = vpack.c.bf16 %v270_v60, %v270_v60 }
 0x15f   :  { %8467 = vmatpush3.bf16.msra.mxu0 %v9318_v63  ;;  %v9357_v63 = vld [vmem:[%s11762_s1 + $0xcc0] sm:$0xff]   ;;  %v271_v2 = vcombine.high %v269_v62, %v269_v62 }
 0x160   :  { %8496 = vmatprep.subr.bf16.mxu0 %v9321_v6 }
 0x161   :  { %8489 = vmatpush3.bf16.msra.mxu1 %v9320_v4  ;;  %v532_v4 = vpack.c.bf16 %v269_v62, %v269_v62  ;;  %v533_v6 = vpack.c.bf16 %v271_v2, %v271_v2  ;;  %v9396_v2 = vld [vmem:[%s11762_s1 + $0xd50] sm:$0xff]  }
 0x162   :  { %8518 = vmatprep.subr.bf16.mxu1 %v9324_v8  ;;  %6409 = vmatmul.mubr.bf16.vlgmr.msra.gmra.mrb[40].mxu0 %v526_v10  ;;  %v9361_v8 = vld [vmem:[%s11762_s1 + $0xcc8] sm:$0xff]  }
 0x163   :  { %8497 = vmatpush3.bf16.msra.mxu0 %v9323_v12  ;;  %6488 = vmatprep.mubr.bf16.mxu0 %v531_v0  ;;  %v9362_v10 = vld [vmem:[%s11762_s1 + $0xc88] sm:$0xff]   ;;  %v9365_v12 = vld [vmem:[%s11762_s1 + $0xcd0] sm:$0xff]  }
 0x164   :  { %6449 = vmatmul.mubr.bf16.vlgmr.msra.gmra.mrb[40].mxu1 %v528_v13  ;;  %8498 = vmatprep.subr.bf16.mxu0 %v9326_v16  ;;  %v9364_v13 = vld [vmem:[%s11762_s1 + $0xc10] sm:$0xff]   ;;  %v9369_v16 = vld [vmem:[%s11762_s1 + $0xcd8] sm:$0xff]   ;;  %v9394_v0 = vld [vmem:[%s11762_s1 + $0xdc8] sm:$0xff]  }
 0x165   :  { %8519 = vmatpush3.bf16.msra.mxu1 %v9325_v14  ;;  %6528 = vmatprep.mubr.bf16.mxu1 %v533_v6  ;;  %v9366_v14 = vld [vmem:[%s11762_s1 + $0xc90] sm:$0xff]   ;;  %v9400_v6 = vld [vmem:[%s11762_s1 + $0xd58] sm:$0xff]  }
 0x166   :  { %8520 = vmatprep.subr.bf16.mxu1 %v9328_v17  ;;  %v9368_v17 = vld [vmem:[%s11762_s1 + $0xc18] sm:$0xff]  }
 0x167   :  { %8499 = vmatpush3.bf16.msra.mxu0 %v9327_v18  ;;  %v9370_v18 = vld [vmem:[%s11762_s1 + $0xc98] sm:$0xff]  }
 0x168   :  { %8500 = vmatprep.subr.bf16.mxu0 %v9330_v20  ;;  %v9373_v20 = vld [vmem:[%s11762_s1 + $0xce0] sm:$0xff]  }
 0x169   :  { %8521 = vmatpush3.bf16.msra.mxu1 %v9329_v19  ;;  %v9371_v19 = vld [vmem:[%s11762_s1 + $0xc60] sm:$0xff]  }
 0x16a   :  { %8522 = vmatprep.subr.bf16.mxu1 %v9332_v21  ;;  %v9372_v21 = vld [vmem:[%s11762_s1 + $0xc20] sm:$0xff]  }
 0x16b   :  { %8501 = vmatpush3.bf16.msra.mxu0 %v9331_v22  ;;  %v9374_v22 = vld [vmem:[%s11762_s1 + $0xca0] sm:$0xff]  }
 0x16c   :  { %8502 = vmatprep.subr.bf16.mxu0 %v9334_v24  ;;  %v9377_v24 = vld [vmem:[%s11762_s1 + $0xce8] sm:$0xff]  }
 0x16d   :  { %8523 = vmatpush3.bf16.msra.mxu1 %v9333_v23  ;;  %v9375_v23 = vld [vmem:[%s11762_s1 + $0xc68] sm:$0xff]  }
 0x16e   :  { %8524 = vmatprep.subr.bf16.mxu1 %v9336_v25  ;;  %v9376_v25 = vld [vmem:[%s11762_s1 + $0xc28] sm:$0xff]  }
 0x16f   :  { %8503 = vmatpush3.bf16.msra.mxu0 %v9335_v26  ;;  %v9378_v26 = vld [vmem:[%s11762_s1 + $0xca8] sm:$0xff]  }
 0x170   :  { %8504 = vmatprep.subr.bf16.mxu0 %v9338_v28 }
 0x171   :  { %8525 = vmatpush3.bf16.msra.mxu1 %v9337_v27  ;;  %v9379_v27 = vld [vmem:[%s11762_s1 + $0xc70] sm:$0xff]  }
 0x172   :  { %8526 = vmatprep.subr.bf16.mxu1 %v9340_v29 }
 0x173   :  { %8505 = vmatpush3.bf16.msra.mxu0 %v9339_v30 }
 0x174   :  { %8506 = vmatprep.subr.bf16.mxu0 %v9342_v32  ;;  %v9380_v32 = vld [vmem:[%s11762_s1 + $0xc30] sm:$0xff]  }
 0x175   :  { %8527 = vmatpush3.bf16.msra.mxu1 %v9341_v31  ;;  %v8204_v37 = vpop.f32.mrb[16].mxu0 }
 0x176   :  { %8528 = vmatprep.subr.bf16.mxu1 %v9344_v33  ;;  %v8205_v42 = vpop.f32.mrb[17].mxu0  ;;  %v9381_v33 = vld [vmem:[%s11762_s1 + $0xcf0] sm:$0xff]  }
 0x177   :  { %v8226_v38 = vpop.f32.mrb[16].mxu1  ;;  %v8206_v44 = vadd.f32 %v8205_v42, %v8204_v37  ;;  %v8207_v45 = vpop.f32.mrb[18].mxu0  ;;  %8507 = vmatpush3.bf16.msra.mxu0 %v9343_v34  ;;  %v9382_v37 = vld [vmem:[%s11762_s1 + $0xcb0] sm:$0xff]   ;;  %v9384_v42 = vld [vmem:[%s11762_s1 + $0xc38] sm:$0xff]  }
 0x178   :  { %v8227_v43 = vpop.f32.mrb[17].mxu1  ;;  %v8208_v48 = vpop.f32.mrb[19].mxu0  ;;  %8508 = vmatprep.subr.bf16.mxu0 %v9346_v36 }
 0x179   :  { %v8228_v46 = vadd.f32 %v8227_v43, %v8226_v38  ;;  %8529 = vmatpush3.bf16.msra.mxu1 %v9345_v35  ;;  %v5931_v50 = vadd.f32 %v8206_v44, %v10795_v3  ;;  %v8229_v53 = vpop.f32.mrb[18].mxu1  ;;  %v9356_v3 = vld [vmem:[%s11762_s1 + $0xc00] sm:$0xff]   ;;  %v9385_v43 = vld [vmem:[%s11762_s1 + $0xcf8] sm:$0xff]  }
 0x17a   :  { %8530 = vmatprep.subr.bf16.mxu1 %v9348_v40  ;;  %v8230_v57 = vpop.f32.mrb[19].mxu1  ;;  %v40_v44 = vld [vmem:[%s11761_s0 + $0x60] sm:$0xff]  ;;  %v9386_v48 = vld [vmem:[%s11762_s1 + $0xcb8] sm:$0xff]  }
 0x17b   :  { %v10899_v58 = vadd.f32 %v8228_v46, %v5931_v50  ;;  %8509 = vmatpush3.bf16.msra.mxu0 %v9347_v39  ;;  %v9383_v39 = vld [vmem:[%s11762_s1 + $0xc78] sm:$0xff]  }
 0x17c   :  { %8510 = vmatprep.subr.bf16.mxu0 %v9350_v49  ;;  %v272_v49 = vcombine.high %v40_v44, %v40_v44 }
 0x17d   :  { %8531 = vmatpush3.bf16.msra.mxu1 %v9349_v47  ;;  %v279_v47 = vrot.slane %v40_v44, %v9779_v41 }
 0x17e   :  { %8532 = vmatprep.subr.bf16.mxu1 %v9352_v51  ;;  %v9387_v51 = vld [vmem:[%s11762_s1 + $0xd40] sm:$0xff]   ;;  %v286_v53 = vrot.slane %v272_v49, %v9779_v41 }
 0x17f   :  { %8511 = vmatpush3.bf16.msra.mxu0 %v9351_v54  ;;  %v287_v52 = vcombine.high %v279_v47, %v279_v47  ;;  %v9389_v54 = vld [vmem:[%s11762_s1 + $0xd00] sm:$0xff]   ;;  %v534_v55 = vpack.c.bf16 %v279_v47, %v279_v47 }
 0x180   :  { %8540 = vmatprep.subr.bf16.mxu0 %v9354_v61  ;;  %v536_v60 = vpack.c.bf16 %v286_v53, %v286_v53  ;;  %v9392_v61 = vld [vmem:[%s11762_s1 + $0xd48] sm:$0xff]   ;;  %v9422_v49 = vld [vmem:[%s11762_s1 + $0xe00] sm:$0xff]  }
 0x181   :  { %8533 = vmatpush3.bf16.msra.mxu1 %v9353_v59  ;;  %v535_v57 = vpack.c.bf16 %v287_v52, %v287_v52  ;;  %v9391_v59 = vld [vmem:[%s11762_s1 + $0xd80] sm:$0xff]  }
 0x182   :  { %8562 = vmatprep.subr.bf16.mxu1 %v9357_v63  ;;  %6489 = vmatmul.mubr.bf16.vlgmr.msra.gmra.mrb[44].mxu0 %v530_v1  ;;  %v9393_v63 = vld [vmem:[%s11762_s1 + $0xd08] sm:$0xff]  }
 0x183   :  { %8541 = vmatpush3.bf16.msra.mxu0 %v9356_v3  ;;  %6568 = vmatprep.mubr.bf16.mxu0 %v535_v57  ;;  %v9395_v1 = vld [vmem:[%s11762_s1 + $0xd88] sm:$0xff]   ;;  %v9397_v3 = vld [vmem:[%s11762_s1 + $0xd10] sm:$0xff]  }
 0x184   :  { %6529 = vmatmul.mubr.bf16.vlgmr.msra.gmra.mrb[44].mxu1 %v532_v4  ;;  %8542 = vmatprep.subr.bf16.mxu0 %v9359_v7  ;;  %v9398_v4 = vld [vmem:[%s11762_s1 + $0xdd0] sm:$0xff]   ;;  %v9401_v7 = vld [vmem:[%s11762_s1 + $0xd18] sm:$0xff]   ;;  %v9428_v57 = vld [vmem:[%s11762_s1 + $0xe88] sm:$0xff]  }
 0x185   :  { %8563 = vmatpush3.bf16.msra.mxu1 %v9358_v5  ;;  %v9399_v5 = vld [vmem:[%s11762_s1 + $0xd90] sm:$0xff]  }
 0x186   :  { %8564 = vmatprep.subr.bf16.mxu1 %v9361_v8  ;;  %v9402_v8 = vld [vmem:[%s11762_s1 + $0xdd8] sm:$0xff]  }
 0x187   :  { %8543 = vmatpush3.bf16.msra.mxu0 %v9360_v9  ;;  %v9403_v9 = vld [vmem:[%s11762_s1 + $0xd98] sm:$0xff]  }
 0x188   :  { %8544 = vmatprep.subr.bf16.mxu0 %v9363_v11  ;;  %v9405_v11 = vld [vmem:[%s11762_s1 + $0xd20] sm:$0xff]  }
 0x189   :  { %8565 = vmatpush3.bf16.msra.mxu1 %v9362_v10  ;;  %v9404_v10 = vld [vmem:[%s11762_s1 + $0xd60] sm:$0xff]  }
 0x18a   :  { %8566 = vmatprep.subr.bf16.mxu1 %v9365_v12  ;;  %v9406_v12 = vld [vmem:[%s11762_s1 + $0xde0] sm:$0xff]  }
 0x18b   :  { %8545 = vmatpush3.bf16.msra.mxu0 %v9364_v13  ;;  %v9407_v13 = vld [vmem:[%s11762_s1 + $0xda0] sm:$0xff]  }
 0x18c   :  { %8546 = vmatprep.subr.bf16.mxu0 %v9367_v15  ;;  %v9409_v15 = vld [vmem:[%s11762_s1 + $0xd28] sm:$0xff]  }
 0x18d   :  { %8567 = vmatpush3.bf16.msra.mxu1 %v9366_v14  ;;  %v9408_v14 = vld [vmem:[%s11762_s1 + $0xd68] sm:$0xff]  }
 0x18e   :  { %8568 = vmatprep.subr.bf16.mxu1 %v9369_v16  ;;  %v9410_v16 = vld [vmem:[%s11762_s1 + $0xde8] sm:$0xff]  }
 0x18f   :  { %8547 = vmatpush3.bf16.msra.mxu0 %v9368_v17  ;;  %v9411_v17 = vld [vmem:[%s11762_s1 + $0xda8] sm:$0xff]  }
 0x190   :  { %8548 = vmatprep.subr.bf16.mxu0 %v9371_v19 }
 0x191   :  { %8569 = vmatpush3.bf16.msra.mxu1 %v9370_v18  ;;  %v9412_v18 = vld [vmem:[%s11762_s1 + $0xd70] sm:$0xff]  }
 0x192   :  { %8570 = vmatprep.subr.bf16.mxu1 %v9373_v20 }
 0x193   :  { %8549 = vmatpush3.bf16.msra.mxu0 %v9372_v21  ;;  %v9413_v21 = vld [vmem:[%s11762_s1 + $0xd30] sm:$0xff]  }
 0x194   :  { %8550 = vmatprep.subr.bf16.mxu0 %v9375_v23 }
 0x195   :  { %8571 = vmatpush3.bf16.msra.mxu1 %v9374_v22  ;;  %v8248_v28 = vpop.f32.mrb[20].mxu0  ;;  %v9414_v22 = vld [vmem:[%s11762_s1 + $0xdf0] sm:$0xff]  }
 0x196   :  { %8572 = vmatprep.subr.bf16.mxu1 %v9377_v24  ;;  %v8249_v30 = vpop.f32.mrb[21].mxu0 }
 0x197   :  { %v8270_v29 = vpop.f32.mrb[20].mxu1  ;;  %v8250_v34 = vadd.f32 %v8249_v30, %v8248_v28  ;;  %v8251_v35 = vpop.f32.mrb[22].mxu0  ;;  %8551 = vmatpush3.bf16.msra.mxu0 %v9376_v25  ;;  %v9415_v28 = vld [vmem:[%s11762_s1 + $0xdb0] sm:$0xff]   ;;  %v9416_v30 = vld [vmem:[%s11762_s1 + $0xd78] sm:$0xff]  }
 0x198   :  { %v8271_v31 = vpop.f32.mrb[21].mxu1  ;;  %v8252_v38 = vpop.f32.mrb[23].mxu0  ;;  %8552 = vmatprep.subr.bf16.mxu0 %v9379_v27 }
 0x199   :  { %v8272_v36 = vadd.f32 %v8271_v31, %v8270_v29  ;;  %8573 = vmatpush3.bf16.msra.mxu1 %v9378_v26  ;;  %v6011_v40 = vadd.f32 %v8250_v34, %v10899_v58  ;;  %v8273_v45 = vpop.f32.mrb[22].mxu1  ;;  %v288_v58 = vcombine.high %v286_v53, %v286_v53  ;;  %v9418_v34 = vld [vmem:[%s11762_s1 + $0xdf8] sm:$0xff]   ;;  %v9424_v53 = vld [vmem:[%s11762_s1 + $0xe80] sm:$0xff]  }
 0x19a   :  { %8574 = vmatprep.subr.bf16.mxu1 %v9381_v33  ;;  %v8274_v50 = vpop.f32.mrb[23].mxu1 }
 0x19b   :  { %v11002_v46 = vadd.f32 %v8272_v36, %v6011_v40  ;;  %8553 = vmatpush3.bf16.msra.mxu0 %v9380_v32  ;;  %v537_v62 = vpack.c.bf16 %v288_v58, %v288_v58  ;;  %v9417_v32 = vld [vmem:[%s11762_s1 + $0xd38] sm:$0xff]   ;;  %v9431_v58 = vld [vmem:[%s11762_s1 + $0xed0] sm:$0xff]  }
 0x19c   :  { %8554 = vmatprep.subr.bf16.mxu0 %v9383_v39  ;;  %v9419_v39 = vld [vmem:[%s11762_s1 + $0xdb8] sm:$0xff]  }
 0x19d   :  { %8575 = vmatpush3.bf16.msra.mxu1 %v9382_v37  ;;  %6608 = vmatprep.mubr.bf16.mxu1 %v537_v62  ;;  %v41_v37 = vld [vmem:[%s11761_s0 + $0x68] sm:$0xff]  ;;  %v9435_v62 = vld [vmem:[%s11762_s1 + $0xed8] sm:$0xff]  }
 0x19e   :  { %8576 = vmatprep.subr.bf16.mxu1 %v9385_v43  ;;  %v296_v38 = vrot.slane %v41_v37, %v9779_v41  ;;  %v289_v40 = vcombine.high %v41_v37, %v41_v37  ;;  %v9456_v37 = vld [vmem:[%s11762_s1 + $0xfc0] sm:$0xff]  }
 0x19f   :  { %8555 = vmatpush3.bf16.msra.mxu0 %v9384_v42  ;;  %v9420_v42 = vld [vmem:[%s11762_s1 + $0xe40] sm:$0xff]  }
 0x1a0   :  { %8584 = vmatprep.subr.bf16.mxu0 %v9387_v51  ;;  %v304_v43 = vcombine.high %v296_v38, %v296_v38  ;;  %v303_v44 = vrot.slane %v289_v40, %v9779_v41  ;;  %v538_v45 = vpack.c.bf16 %v296_v38, %v296_v38  ;;  %v9425_v51 = vld [vmem:[%s11762_s1 + $0xe48] sm:$0xff]   ;;  %v9457_v40 = vld [vmem:[%s11762_s1 + $0xf80] sm:$0xff]  }
 0x1a1   :  { %8577 = vmatpush3.bf16.msra.mxu1 %v9386_v48 }
 0x1a2   :  { %8606 = vmatprep.subr.bf16.mxu1 %v9390_v56  ;;  %6569 = vmatmul.mubr.bf16.vlgmr.msra.gmra.mrb[48].mxu0 %v534_v55  ;;  %v539_v47 = vpack.c.bf16 %v304_v43, %v304_v43  ;;  %v305_v48 = vcombine.high %v303_v44, %v303_v44  ;;  %v540_v50 = vpack.c.bf16 %v303_v44, %v303_v44  ;;  %v9426_v55 = vld [vmem:[%s11762_s1 + $0xe08] sm:$0xff]   ;;  %v9429_v56 = vld [vmem:[%s11762_s1 + $0xe50] sm:$0xff]  }
 0x1a3   :  { %8585 = vmatpush3.bf16.msra.mxu0 %v9389_v54  ;;  %v9427_v54 = vld [vmem:[%s11762_s1 + $0xec8] sm:$0xff]  }
 0x1a4   :  { %6609 = vmatmul.mubr.bf16.vlgmr.msra.gmra.mrb[48].mxu1 %v536_v60  ;;  %8586 = vmatprep.subr.bf16.mxu0 %v9392_v61  ;;  %v541_v52 = vpack.c.bf16 %v305_v48, %v305_v48  ;;  %v9433_v60 = vld [vmem:[%s11762_s1 + $0xe58] sm:$0xff]   ;;  %v9432_v61 = vld [vmem:[%s11762_s1 + $0xe90] sm:$0xff]   ;;  %v9458_v43 = vld [vmem:[%s11762_s1 + $0xf48] sm:$0xff]  }
 0x1a5   :  { %8607 = vmatpush3.bf16.msra.mxu1 %v9391_v59  ;;  %6648 = vmatprep.mubr.bf16.mxu0 %v539_v47  ;;  %v9430_v59 = vld [vmem:[%s11762_s1 + $0xe10] sm:$0xff]   ;;  %v9461_v47 = vld [vmem:[%s11762_s1 + $0xf88] sm:$0xff]  }
 0x1a6   :  { %8608 = vmatprep.subr.bf16.mxu1 %v9394_v0  ;;  %6688 = vmatprep.mubr.bf16.mxu1 %v541_v52  ;;  %v9437_v0 = vld [vmem:[%s11762_s1 + $0xe60] sm:$0xff]   ;;  %v9462_v48 = vld [vmem:[%s11762_s1 + $0xf50] sm:$0xff]   ;;  %v9466_v52 = vld [vmem:[%s11762_s1 + $0xf58] sm:$0xff]  }
 0x1a7   :  { %8587 = vmatpush3.bf16.msra.mxu0 %v9393_v63  ;;  %v9434_v63 = vld [vmem:[%s11762_s1 + $0xe18] sm:$0xff]  }
 0x1a8   :  { %8588 = vmatprep.subr.bf16.mxu0 %v9396_v2  ;;  %v9439_v2 = vld [vmem:[%s11762_s1 + $0xee0] sm:$0xff]  }
 0x1a9   :  { %8609 = vmatpush3.bf16.msra.mxu1 %v9395_v1  ;;  %v9436_v1 = vld [vmem:[%s11762_s1 + $0xe98] sm:$0xff]  }
 0x1aa   :  { %8610 = vmatprep.subr.bf16.mxu1 %v9398_v4  ;;  %v9441_v4 = vld [vmem:[%s11762_s1 + $0xe68] sm:$0xff]  }
 0x1ab   :  { %8589 = vmatpush3.bf16.msra.mxu0 %v9397_v3  ;;  %v9438_v3 = vld [vmem:[%s11762_s1 + $0xe20] sm:$0xff]  }
 0x1ac   :  { %8590 = vmatprep.subr.bf16.mxu0 %v9400_v6  ;;  %v9443_v6 = vld [vmem:[%s11762_s1 + $0xee8] sm:$0xff]  }
 0x1ad   :  { %8611 = vmatpush3.bf16.msra.mxu1 %v9399_v5  ;;  %v9440_v5 = vld [vmem:[%s11762_s1 + $0xea0] sm:$0xff]  }
 0x1ae   :  { %8612 = vmatprep.subr.bf16.mxu1 %v9402_v8 }
 0x1af   :  { %8591 = vmatpush3.bf16.msra.mxu0 %v9401_v7  ;;  %v9442_v7 = vld [vmem:[%s11762_s1 + $0xe28] sm:$0xff]  }
 0x1b0   :  { %8592 = vmatprep.subr.bf16.mxu0 %v9404_v10  ;;  %v9444_v10 = vld [vmem:[%s11762_s1 + $0xea8] sm:$0xff]  }
 0x1b1   :  { %8613 = vmatpush3.bf16.msra.mxu1 %v9403_v9 }
 0x1b2   :  { %8614 = vmatprep.subr.bf16.mxu1 %v9406_v12 }
 0x1b3   :  { %8593 = vmatpush3.bf16.msra.mxu0 %v9405_v11  ;;  %v9445_v11 = vld [vmem:[%s11762_s1 + $0xe70] sm:$0xff]  }
 0x1b4   :  { %8594 = vmatprep.subr.bf16.mxu0 %v9408_v14  ;;  %v9446_v14 = vld [vmem:[%s11762_s1 + $0xe30] sm:$0xff]  }
 0x1b5   :  { %v8292_v19 = vpop.f32.mrb[24].mxu0  ;;  %8615 = vmatpush3.bf16.msra.mxu1 %v9407_v13 }
 0x1b6   :  { %v8293_v23 = vpop.f32.mrb[25].mxu0  ;;  %8616 = vmatprep.subr.bf16.mxu1 %v9410_v16 }
 0x1b7   :  { %v8314_v20 = vpop.f32.mrb[24].mxu1  ;;  %v8294_v25 = vadd.f32 %v8293_v23, %v8292_v19  ;;  %v8295_v26 = vpop.f32.mrb[26].mxu0  ;;  %8595 = vmatpush3.bf16.msra.mxu0 %v9409_v15 }
 0x1b8   :  { %v8315_v24 = vpop.f32.mrb[25].mxu1  ;;  %v8296_v29 = vpop.f32.mrb[27].mxu0  ;;  %8596 = vmatprep.subr.bf16.mxu0 %v9412_v18  ;;  %v9447_v18 = vld [vmem:[%s11762_s1 + $0xef0] sm:$0xff]  }
 0x1b9   :  { %v8316_v27 = vadd.f32 %v8315_v24, %v8314_v20  ;;  %v6091_v31 = vadd.f32 %v8294_v25, %v11002_v46  ;;  %8617 = vmatpush3.bf16.msra.mxu1 %v9411_v17  ;;  %v8317_v33 = vpop.f32.mrb[26].mxu1  ;;  %v9423_v46 = vld [vmem:[%s11762_s1 + $0xec0] sm:$0xff]   ;;  %v9448_v20 = vld [vmem:[%s11762_s1 + $0xeb0] sm:$0xff]   ;;  %v9450_v24 = vld [vmem:[%s11762_s1 + $0xe38] sm:$0xff]  }
 0x1ba   :  { %8618 = vmatprep.subr.bf16.mxu1 %v9414_v22  ;;  %v8318_v35 = vpop.f32.mrb[27].mxu1  ;;  %v9449_v22 = vld [vmem:[%s11762_s1 + $0xe78] sm:$0xff]  }
 0x1bb   :  { %v11103_v36 = vadd.f32 %v8316_v27, %v6091_v31  ;;  %8597 = vmatpush3.bf16.msra.mxu0 %v9413_v21  ;;  %v9451_v27 = vld [vmem:[%s11762_s1 + $0xef8] sm:$0xff]   ;;  %v9455_v35 = vld [vmem:[%s11762_s1 + $0xf00] sm:$0xff]  }
 0x1bc   :  { %8598 = vmatprep.subr.bf16.mxu0 %v9416_v30  ;;  %v9452_v30 = vld [vmem:[%s11762_s1 + $0xeb8] sm:$0xff]  }
 0x1bd   :  { %8619 = vmatpush3.bf16.msra.mxu1 %v9415_v28  ;;  %v42_v28 = vld [vmem:[%s11761_s0 + $0x70] sm:$0xff] }
 0x1be   :  { %8620 = vmatprep.subr.bf16.mxu1 %v9418_v34  ;;  %v313_v29 = vrot.slane %v42_v28, %v9779_v41  ;;  %v306_v31 = vcombine.high %v42_v28, %v42_v28 }
 0x1bf   :  { %8599 = vmatpush3.bf16.msra.mxu0 %v9417_v32  ;;  %v9453_v32 = vld [vmem:[%s11762_s1 + $0xf40] sm:$0xff]  }
 0x1c0   :  { %8628 = vmatprep.subr.bf16.mxu0 %v9420_v42  ;;  %v321_v33 = vcombine.high %v313_v29, %v313_v29  ;;  %v320_v34 = vrot.slane %v306_v31, %v9779_v41 }
 0x1c1   :  { %8621 = vmatpush3.bf16.msra.mxu1 %v9419_v39 }
 0x1c2   :  { %8650 = vmatprep.subr.bf16.mxu1 %v9423_v46  ;;  %6649 = vmatmul.mubr.bf16.vlgmr.msra.gmra.mrb[52].mxu0 %v538_v45  ;;  %v543_v38 = vpack.c.bf16 %v321_v33, %v321_v33  ;;  %v322_v39 = vcombine.high %v320_v34, %v320_v34  ;;  %v544_v42 = vpack.c.bf16 %v320_v34, %v320_v34  ;;  %v9459_v45 = vld [vmem:[%s11762_s1 + $0xf08] sm:$0xff]   ;;  %v9490_v34 = vld [vmem:[%s11762_s1 + $0x1080] sm:$0xff]  }
 0x1c3   :  { %8629 = vmatpush3.bf16.msra.mxu0 %v9422_v49  ;;  %v9460_v46 = vld [vmem:[%s11762_s1 + $0xfc8] sm:$0xff]   ;;  %v9463_v49 = vld [vmem:[%s11762_s1 + $0xf10] sm:$0xff]  }
 0x1c4   :  { %6689 = vmatmul.mubr.bf16.vlgmr.msra.gmra.mrb[52].mxu1 %v540_v50  ;;  %8630 = vmatprep.subr.bf16.mxu0 %v9425_v51  ;;  %v545_v44 = vpack.c.bf16 %v322_v39, %v322_v39  ;;  %v9464_v50 = vld [vmem:[%s11762_s1 + $0xfd0] sm:$0xff]  }
 0x1c5   :  { %8651 = vmatpush3.bf16.msra.mxu1 %v9424_v53  ;;  %6728 = vmatprep.mubr.bf16.mxu0 %v543_v38  ;;  %v9465_v51 = vld [vmem:[%s11762_s1 + $0xf90] sm:$0xff]   ;;  %v9467_v53 = vld [vmem:[%s11762_s1 + $0xf18] sm:$0xff]   ;;  %v9494_v38 = vld [vmem:[%s11762_s1 + $0x1088] sm:$0xff]  }
 0x1c6   :  { %8652 = vmatprep.subr.bf16.mxu1 %v9427_v54  ;;  %6768 = vmatprep.mubr.bf16.mxu1 %v545_v44  ;;  %v9468_v54 = vld [vmem:[%s11762_s1 + $0xfd8] sm:$0xff]   ;;  %v9497_v39 = vld [vmem:[%s11762_s1 + $0x10d0] sm:$0xff]  }
 0x1c7   :  { %8631 = vmatpush3.bf16.msra.mxu0 %v9426_v55  ;;  %v9469_v55 = vld [vmem:[%s11762_s1 + $0xf98] sm:$0xff]  }
 0x1c8   :  { %8632 = vmatprep.subr.bf16.mxu0 %v9429_v56  ;;  %v9470_v56 = vld [vmem:[%s11762_s1 + $0xf60] sm:$0xff]   ;;  %v9501_v44 = vld [vmem:[%s11762_s1 + $0x10d8] sm:$0xff]  }
 0x1c9   :  { %8653 = vmatpush3.bf16.msra.mxu1 %v9428_v57  ;;  %v9471_v57 = vld [vmem:[%s11762_s1 + $0xf20] sm:$0xff]  }
 0x1ca   :  { %8654 = vmatprep.subr.bf16.mxu1 %v9431_v58  ;;  %v9472_v58 = vld [vmem:[%s11762_s1 + $0xfe0] sm:$0xff]  }
 0x1cb   :  { %8633 = vmatpush3.bf16.msra.mxu0 %v9430_v59  ;;  %v9473_v59 = vld [vmem:[%s11762_s1 + $0xfa0] sm:$0xff]  }
 0x1cc   :  { %8634 = vmatprep.subr.bf16.mxu0 %v9433_v60  ;;  %v9474_v60 = vld [vmem:[%s11762_s1 + $0xf68] sm:$0xff]  }
 0x1cd   :  { %8655 = vmatpush3.bf16.msra.mxu1 %v9432_v61  ;;  %v9475_v61 = vld [vmem:[%s11762_s1 + $0xf28] sm:$0xff]  }
 0x1ce   :  { %8656 = vmatprep.subr.bf16.mxu1 %v9435_v62  ;;  %v9476_v62 = vld [vmem:[%s11762_s1 + $0xfe8] sm:$0xff]  }
 0x1cf   :  { %8635 = vmatpush3.bf16.msra.mxu0 %v9434_v63  ;;  %v9477_v63 = vld [vmem:[%s11762_s1 + $0xfa8] sm:$0xff]  }
 0x1d0   :  { %8636 = vmatprep.subr.bf16.mxu0 %v9437_v0 }
 0x1d1   :  { %8657 = vmatpush3.bf16.msra.mxu1 %v9436_v1 }
 0x1d2   :  { %8658 = vmatprep.subr.bf16.mxu1 %v9439_v2 }
 0x1d3   :  { %8637 = vmatpush3.bf16.msra.mxu0 %v9438_v3 }
 0x1d4   :  { %8638 = vmatprep.subr.bf16.mxu0 %v9441_v4  ;;  %v9478_v4 = vld [vmem:[%s11762_s1 + $0xf70] sm:$0xff]  }
 0x1d5   :  { %v8336_v8 = vpop.f32.mrb[28].mxu0  ;;  %8659 = vmatpush3.bf16.msra.mxu1 %v9440_v5  ;;  %v9479_v5 = vld [vmem:[%s11762_s1 + $0xf30] sm:$0xff]  }
 0x1d6   :  { %v8337_v12 = vpop.f32.mrb[29].mxu0  ;;  %8660 = vmatprep.subr.bf16.mxu1 %v9443_v6 }
 0x1d7   :  { %v8358_v9 = vpop.f32.mrb[28].mxu1  ;;  %v8338_v15 = vadd.f32 %v8337_v12, %v8336_v8  ;;  %v8339_v16 = vpop.f32.mrb[30].mxu0  ;;  %8639 = vmatpush3.bf16.msra.mxu0 %v9442_v7 }
 0x1d8   :  { %v8359_v13 = vpop.f32.mrb[29].mxu1  ;;  %v8340_v19 = vpop.f32.mrb[31].mxu0  ;;  %8640 = vmatprep.subr.bf16.mxu0 %v9445_v11  ;;  %v9481_v11 = vld [vmem:[%s11762_s1 + $0xfb0] sm:$0xff]   ;;  %v9483_v16 = vld [vmem:[%s11762_s1 + $0xf38] sm:$0xff]  }
 0x1d9   :  { %v8360_v17 = vadd.f32 %v8359_v13, %v8358_v9  ;;  %v6171_v21 = vadd.f32 %v8338_v15, %v11103_v36  ;;  %v8361_v23 = vpop.f32.mrb[30].mxu1  ;;  %8661 = vmatpush3.bf16.msra.mxu1 %v9444_v10  ;;  %v542_v36 = vpack.c.bf16 %v313_v29, %v313_v29  ;;  %v9480_v9 = vld [vmem:[%s11762_s1 + $0xff0] sm:$0xff]   ;;  %v9482_v13 = vld [vmem:[%s11762_s1 + $0xf78] sm:$0xff]  }
 0x1da   :  { %v8362_v25 = vpop.f32.mrb[31].mxu1  ;;  %8662 = vmatprep.subr.bf16.mxu1 %v9447_v18  ;;  %v9484_v18 = vld [vmem:[%s11762_s1 + $0xff8] sm:$0xff]   ;;  %v9486_v23 = vld [vmem:[%s11762_s1 + $0x1040] sm:$0xff]  }
 0x1db   :  { %v11204_v26 = vadd.f32 %v8360_v17, %v6171_v21  ;;  %8641 = vmatpush3.bf16.msra.mxu0 %v9446_v14  ;;  %v43_v19 = vld [vmem:[%s11761_s0 + $0x78] sm:$0xff] }
 0x1dc   :  { %8642 = vmatprep.subr.bf16.mxu0 %v9449_v22  ;;  %v9485_v21 = vld [vmem:[%s11762_s1 + $0xfb8] sm:$0xff]   ;;  %v323_v22 = vcombine.high %v43_v19, %v43_v19 }
 0x1dd   :  { %8663 = vmatpush3.bf16.msra.mxu1 %v9448_v20  ;;  %v330_v20 = vrot.slane %v43_v19, %v9779_v41  ;;  %v9522_v19 = vld [vmem:[%s11762_s1 + $0x11c0] sm:$0xff]  }
 0x1de   :  { %8664 = vmatprep.subr.bf16.mxu1 %v9451_v27  ;;  %v337_v25 = vrot.slane %v323_v22, %v9779_v41  ;;  %v9489_v27 = vld [vmem:[%s11762_s1 + $0x10c0] sm:$0xff]  }
 0x1df   :  { %8643 = vmatpush3.bf16.msra.mxu0 %v9450_v24  ;;  %v338_v24 = vcombine.high %v330_v20, %v330_v20  ;;  %v9523_v22 = vld [vmem:[%s11762_s1 + $0x1180] sm:$0xff]  }
 0x1e0   :  { %8672 = vmatprep.subr.bf16.mxu0 %v9453_v32  ;;  %v339_v29 = vcombine.high %v337_v25, %v337_v25  ;;  %v548_v31 = vpack.c.bf16 %v337_v25, %v337_v25  ;;  %v9491_v32 = vld [vmem:[%s11762_s1 + $0x1048] sm:$0xff]  }
 0x1e1   :  { %8665 = vmatpush3.bf16.msra.mxu1 %v9452_v30  ;;  %v547_v28 = vpack.c.bf16 %v338_v24, %v338_v24  ;;  %v9488_v30 = vld [vmem:[%s11762_s1 + $0x1000] sm:$0xff]   ;;  %v9524_v24 = vld [vmem:[%s11762_s1 + $0x1148] sm:$0xff]  }
 0x1e2   :  { %6729 = vmatmul.mubr.bf16.vlgmr.msra.gmra.mrb[56].mxu0 %v542_v36  ;;  %8694 = vmatprep.subr.bf16.mxu1 %v9456_v37  ;;  %v549_v33 = vpack.c.bf16 %v339_v29, %v339_v29  ;;  %v9492_v36 = vld [vmem:[%s11762_s1 + $0x1008] sm:$0xff]   ;;  %v9495_v37 = vld [vmem:[%s11762_s1 + $0x1050] sm:$0xff]  }
 0x1e3   :  { %8673 = vmatpush3.bf16.msra.mxu0 %v9455_v35  ;;  %6808 = vmatprep.mubr.bf16.mxu0 %v547_v28  ;;  %v9493_v35 = vld [vmem:[%s11762_s1 + $0x10c8] sm:$0xff]   ;;  %v9528_v29 = vld [vmem:[%s11762_s1 + $0x1150] sm:$0xff]  }
 0x1e4   :  { %6769 = vmatmul.mubr.bf16.vlgmr.msra.gmra.mrb[56].mxu1 %v544_v42  ;;  %8674 = vmatprep.subr.bf16.mxu0 %v9458_v43  ;;  %v9499_v42 = vld [vmem:[%s11762_s1 + $0x1058] sm:$0xff]   ;;  %v9498_v43 = vld [vmem:[%s11762_s1 + $0x1090] sm:$0xff]   ;;  %v9527_v28 = vld [vmem:[%s11762_s1 + $0x1188] sm:$0xff]  }
 0x1e5   :  { %8695 = vmatpush3.bf16.msra.mxu1 %v9457_v40  ;;  %6848 = vmatprep.mubr.bf16.mxu1 %v549_v33  ;;  %v9496_v40 = vld [vmem:[%s11762_s1 + $0x1010] sm:$0xff]   ;;  %v9532_v33 = vld [vmem:[%s11762_s1 + $0x1158] sm:$0xff]  }
 0x1e6   :  { %8696 = vmatprep.subr.bf16.mxu1 %v9460_v46  ;;  %v9503_v46 = vld [vmem:[%s11762_s1 + $0x1060] sm:$0xff]  }
 0x1e7   :  { %8675 = vmatpush3.bf16.msra.mxu0 %v9459_v45  ;;  %v9500_v45 = vld [vmem:[%s11762_s1 + $0x1018] sm:$0xff]  }
 0x1e8   :  { %8676 = vmatprep.subr.bf16.mxu0 %v9462_v48  ;;  %v9505_v48 = vld [vmem:[%s11762_s1 + $0x10e0] sm:$0xff]  }
 0x1e9   :  { %8697 = vmatpush3.bf16.msra.mxu1 %v9461_v47  ;;  %v9502_v47 = vld [vmem:[%s11762_s1 + $0x1098] sm:$0xff]  }
 0x1ea   :  { %8698 = vmatprep.subr.bf16.mxu1 %v9464_v50  ;;  %v9507_v50 = vld [vmem:[%s11762_s1 + $0x1068] sm:$0xff]  }
 0x1eb   :  { %8677 = vmatpush3.bf16.msra.mxu0 %v9463_v49  ;;  %v9504_v49 = vld [vmem:[%s11762_s1 + $0x1020] sm:$0xff]  }
 0x1ec   :  { %8678 = vmatprep.subr.bf16.mxu0 %v9466_v52  ;;  %v9509_v52 = vld [vmem:[%s11762_s1 + $0x10e8] sm:$0xff]  }
 0x1ed   :  { %8699 = vmatpush3.bf16.msra.mxu1 %v9465_v51  ;;  %v9506_v51 = vld [vmem:[%s11762_s1 + $0x10a0] sm:$0xff]  }
 0x1ee   :  { %8700 = vmatprep.subr.bf16.mxu1 %v9468_v54  ;;  %v9508_v54 = vld [vmem:[%s11762_s1 + $0x1028] sm:$0xff]  }
 0x1ef   :  { %8679 = vmatpush3.bf16.msra.mxu0 %v9467_v53 }
 0x1f0   :  { %8680 = vmatprep.subr.bf16.mxu0 %v9470_v56 }
 0x1f1   :  { %8701 = vmatpush3.bf16.msra.mxu1 %v9469_v55 }
 0x1f2   :  { %8702 = vmatprep.subr.bf16.mxu1 %v9472_v58  ;;  %v9511_v58 = vld [vmem:[%s11762_s1 + $0x1070] sm:$0xff]  }
 0x1f3   :  { %8681 = vmatpush3.bf16.msra.mxu0 %v9471_v57  ;;  %v9510_v57 = vld [vmem:[%s11762_s1 + $0x10a8] sm:$0xff]  }
 0x1f4   :  { %8682 = vmatprep.subr.bf16.mxu0 %v9474_v60 }
 0x1f5   :  { %v8380_v0 = vpop.f32.mrb[32].mxu0  ;;  %8703 = vmatpush3.bf16.msra.mxu1 %v9473_v59 }
 0x1f6   :  { %v8381_v2 = vpop.f32.mrb[33].mxu0  ;;  %8704 = vmatprep.subr.bf16.mxu1 %v9476_v62  ;;  %v9512_v62 = vld [vmem:[%s11762_s1 + $0x1030] sm:$0xff]  }
 0x1f7   :  { %v8402_v1 = vpop.f32.mrb[32].mxu1  ;;  %v8382_v6 = vadd.f32 %v8381_v2, %v8380_v0  ;;  %v8383_v7 = vpop.f32.mrb[34].mxu0  ;;  %8683 = vmatpush3.bf16.msra.mxu0 %v9475_v61 }
 0x1f8   :  { %v8403_v3 = vpop.f32.mrb[33].mxu1  ;;  %v8384_v10 = vpop.f32.mrb[35].mxu0  ;;  %8684 = vmatprep.subr.bf16.mxu0 %v9478_v4 }
 0x1f9   :  { %v8404_v8 = vadd.f32 %v8403_v3, %v8402_v1  ;;  %v6251_v12 = vadd.f32 %v8382_v6, %v11204_v26  ;;  %8705 = vmatpush3.bf16.msra.mxu1 %v9477_v63  ;;  %v8405_v14 = vpop.f32.mrb[34].mxu1  ;;  %v546_v26 = vpack.c.bf16 %v330_v20, %v330_v20  ;;  %v9513_v1 = vld [vmem:[%s11762_s1 + $0x10f0] sm:$0xff]   ;;  %v44_v10 = vld [vmem:[%s11761_s0 + $0x80] sm:$0xff] }
 0x1fa   :  { %8706 = vmatprep.subr.bf16.mxu1 %v9480_v9  ;;  %v8406_v17 = vpop.f32.mrb[35].mxu1  ;;  %v9514_v3 = vld [vmem:[%s11762_s1 + $0x10b0] sm:$0xff]   ;;  %v9517_v9 = vld [vmem:[%s11762_s1 + $0x10f8] sm:$0xff]   ;;  %v9519_v14 = vld [vmem:[%s11762_s1 + $0x1140] sm:$0xff]  }
 0x1fb   :  { %v11305_v15 = vadd.f32 %v8404_v8, %v6251_v12  ;;  %8685 = vmatpush3.bf16.msra.mxu0 %v9479_v5  ;;  %v9515_v5 = vld [vmem:[%s11762_s1 + $0x1078] sm:$0xff]   ;;  %v9521_v17 = vld [vmem:[%s11762_s1 + $0x1100] sm:$0xff]  }
 0x1fc   :  { %8686 = vmatprep.subr.bf16.mxu0 %v9482_v13  ;;  %v9516_v8 = vld [vmem:[%s11762_s1 + $0x1038] sm:$0xff]   ;;  %v340_v13 = vcombine.high %v44_v10, %v44_v10 }
 0x1fd   :  { %8707 = vmatpush3.bf16.msra.mxu1 %v9481_v11  ;;  %v347_v11 = vrot.slane %v44_v10, %v9779_v41  ;;  %v9518_v12 = vld [vmem:[%s11762_s1 + $0x10b8] sm:$0xff]   ;;  %v9555_v10 = vld [vmem:[%s11762_s1 + $0x12c0] sm:$0xff]  }
 0x1fe   :  { %8708 = vmatprep.subr.bf16.mxu1 %v9484_v18 }
 0x1ff   :  { %8687 = vmatpush3.bf16.msra.mxu0 %v9483_v16  ;;  %v354_v16 = vrot.slane %v340_v13, %v9779_v41  ;;  %v550_v18 = vpack.c.bf16 %v347_v11, %v347_v11  ;;  %v9556_v13 = vld [vmem:[%s11762_s1 + $0x1280] sm:$0xff]  }
 0x200   :  { %8716 = vmatprep.subr.bf16.mxu0 %v9486_v23 }
 0x201   :  { %8709 = vmatpush3.bf16.msra.mxu1 %v9485_v21  ;;  %v356_v21 = vcombine.high %v354_v16, %v354_v16  ;;  %v552_v23 = vpack.c.bf16 %v354_v16, %v354_v16 }
 0x202   :  { %8738 = vmatprep.subr.bf16.mxu1 %v9489_v27  ;;  %6809 = vmatmul.mubr.bf16.vlgmr.msra.gmra.mrb[60].mxu0 %v546_v26  ;;  %v9525_v26 = vld [vmem:[%s11762_s1 + $0x1108] sm:$0xff]  }
 0x203   :  { %8717 = vmatpush3.bf16.msra.mxu0 %v9488_v30  ;;  %v553_v25 = vpack.c.bf16 %v356_v21, %v356_v21  ;;  %v9526_v27 = vld [vmem:[%s11762_s1 + $0x11c8] sm:$0xff]   ;;  %v9529_v30 = vld [vmem:[%s11762_s1 + $0x1110] sm:$0xff]  }
 0x204   :  { %6849 = vmatmul.mubr.bf16.vlgmr.msra.gmra.mrb[60].mxu1 %v548_v31  ;;  %8718 = vmatprep.subr.bf16.mxu0 %v9491_v32  ;;  %v9530_v31 = vld [vmem:[%s11762_s1 + $0x11d0] sm:$0xff]  }
 0x205   :  { %8739 = vmatpush3.bf16.msra.mxu1 %v9490_v34  ;;  %6928 = vmatprep.mubr.bf16.mxu1 %v553_v25  ;;  %v9531_v32 = vld [vmem:[%s11762_s1 + $0x1190] sm:$0xff]   ;;  %v9533_v34 = vld [vmem:[%s11762_s1 + $0x1118] sm:$0xff]  }
 0x206   :  { %8740 = vmatprep.subr.bf16.mxu1 %v9493_v35  ;;  %v9534_v35 = vld [vmem:[%s11762_s1 + $0x11d8] sm:$0xff]   ;;  %v9562_v21 = vld [vmem:[%s11762_s1 + $0x1210] sm:$0xff]  }
 0x207   :  { %8719 = vmatpush3.bf16.msra.mxu0 %v9492_v36  ;;  %v9535_v36 = vld [vmem:[%s11762_s1 + $0x1198] sm:$0xff]  }
 0x208   :  { %8720 = vmatprep.subr.bf16.mxu0 %v9495_v37  ;;  %v9536_v37 = vld [vmem:[%s11762_s1 + $0x1160] sm:$0xff]   ;;  %v9566_v25 = vld [vmem:[%s11762_s1 + $0x1218] sm:$0xff]  }
 0x209   :  { %8741 = vmatpush3.bf16.msra.mxu1 %v9494_v38  ;;  %v9537_v38 = vld [vmem:[%s11762_s1 + $0x1120] sm:$0xff]  }
 0x20a   :  { %8742 = vmatprep.subr.bf16.mxu1 %v9497_v39  ;;  %v9538_v39 = vld [vmem:[%s11762_s1 + $0x11e0] sm:$0xff]  }
 0x20b   :  { %8721 = vmatpush3.bf16.msra.mxu0 %v9496_v40  ;;  %v9539_v40 = vld [vmem:[%s11762_s1 + $0x11a0] sm:$0xff]  }
 0x20c   :  { %8722 = vmatprep.subr.bf16.mxu0 %v9499_v42  ;;  %v9540_v42 = vld [vmem:[%s11762_s1 + $0x1168] sm:$0xff]  }
 0x20d   :  { %8743 = vmatpush3.bf16.msra.mxu1 %v9498_v43  ;;  %v9541_v43 = vld [vmem:[%s11762_s1 + $0x1128] sm:$0xff]  }
 0x20e   :  { %8744 = vmatprep.subr.bf16.mxu1 %v9501_v44 }
 0x20f   :  { %8723 = vmatpush3.bf16.msra.mxu0 %v9500_v45  ;;  %v9542_v45 = vld [vmem:[%s11762_s1 + $0x11e8] sm:$0xff]  }
 0x210   :  { %8724 = vmatprep.subr.bf16.mxu0 %v9503_v46 }
 0x211   :  { %8745 = vmatpush3.bf16.msra.mxu1 %v9502_v47 }
 0x212   :  { %8746 = vmatprep.subr.bf16.mxu1 %v9505_v48  ;;  %v9543_v48 = vld [vmem:[%s11762_s1 + $0x11a8] sm:$0xff]  }
 0x213   :  { %8725 = vmatpush3.bf16.msra.mxu0 %v9504_v49  ;;  %v9544_v49 = vld [vmem:[%s11762_s1 + $0x1170] sm:$0xff]  }
 0x214   :  { %8726 = vmatprep.subr.bf16.mxu0 %v9507_v50 }
 0x215   :  { %v8424_v53 = vpop.f32.mrb[36].mxu0  ;;  %8747 = vmatpush3.bf16.msra.mxu1 %v9506_v51 }
 0x216   :  { %v8425_v55 = vpop.f32.mrb[37].mxu0  ;;  %8748 = vmatprep.subr.bf16.mxu1 %v9509_v52 }
 0x217   :  { %v8446_v56 = vpop.f32.mrb[36].mxu1  ;;  %v8426_v59 = vadd.f32 %v8425_v55, %v8424_v53  ;;  %v8427_v60 = vpop.f32.mrb[38].mxu0  ;;  %8727 = vmatpush3.bf16.msra.mxu0 %v9508_v54  ;;  %v9545_v55 = vld [vmem:[%s11762_s1 + $0x1130] sm:$0xff]  }
 0x218   :  { %v8447_v61 = vpop.f32.mrb[37].mxu1  ;;  %v8428_v63 = vpop.f32.mrb[39].mxu0  ;;  %8728 = vmatprep.subr.bf16.mxu0 %v9511_v58 }
 0x219   :  { %v8448_v0 = vadd.f32 %v8447_v61, %v8446_v56  ;;  %v6331_v2 = vadd.f32 %v8426_v59, %v11305_v15  ;;  %v8449_v4 = vpop.f32.mrb[38].mxu1  ;;  %8749 = vmatpush3.bf16.msra.mxu1 %v9510_v57  ;;  %v355_v15 = vcombine.high %v347_v11, %v347_v11  ;;  %v9546_v57 = vld [vmem:[%s11762_s1 + $0x11f0] sm:$0xff]   ;;  %v9549_v63 = vld [vmem:[%s11762_s1 + $0x1138] sm:$0xff]  }
 0x21a   :  { %v8450_v6 = vpop.f32.mrb[39].mxu1  ;;  %8750 = vmatprep.subr.bf16.mxu1 %v9513_v1  ;;  %v9547_v59 = vld [vmem:[%s11762_s1 + $0x11b0] sm:$0xff]   ;;  %v45_v1 = vld [vmem:[%s11761_s0 + $0x88] sm:$0xff] }
 0x21b   :  { %v11409_v7 = vadd.f32 %v8448_v0, %v6331_v2  ;;  %8729 = vmatpush3.bf16.msra.mxu0 %v9512_v62  ;;  %v551_v20 = vpack.c.bf16 %v355_v15, %v355_v15  ;;  %v9548_v62 = vld [vmem:[%s11762_s1 + $0x1178] sm:$0xff]   ;;  %v364_v2 = vrot.slane %v45_v1, %v9779_v41  ;;  %v357_v4 = vcombine.high %v45_v1, %v45_v1  ;;  %v9557_v15 = vld [vmem:[%s11762_s1 + $0x1248] sm:$0xff]  }
 0x21c   :  { %8730 = vmatprep.subr.bf16.mxu0 %v9515_v5  ;;  %v9550_v0 = vld [vmem:[%s11762_s1 + $0x11f8] sm:$0xff]   ;;  %v9552_v5 = vld [vmem:[%s11762_s1 + $0x1240] sm:$0xff]  }
 0x21d   :  { %8751 = vmatpush3.bf16.msra.mxu1 %v9514_v3  ;;  %6888 = vmatprep.mubr.bf16.mxu0 %v551_v20  ;;  %v9551_v3 = vld [vmem:[%s11762_s1 + $0x11b8] sm:$0xff]   ;;  %v372_v6 = vcombine.high %v364_v2, %v364_v2  ;;  %v9561_v20 = vld [vmem:[%s11762_s1 + $0x1250] sm:$0xff]  }
 0x21e   :  { %8752 = vmatprep.subr.bf16.mxu1 %v9517_v9  ;;  %v554_v9 = vpack.c.bf16 %v364_v2, %v364_v2  ;;  %v9587_v2 = vld [vmem:[%s11762_s1 + $0x1300] sm:$0xff]  }
 0x21f   :  { %8731 = vmatpush3.bf16.msra.mxu0 %v9516_v8  ;;  %v9554_v8 = vld [vmem:[%s11762_s1 + $0x1200] sm:$0xff]   ;;  %v555_v11 = vpack.c.bf16 %v372_v6, %v372_v6  ;;  %v9629_v6 = vmov 0.0  }
 0x220   :  { %8760 = vmatprep.subr.bf16.mxu0 %v9519_v14 }
 0x221   :  { %8753 = vmatpush3.bf16.msra.mxu1 %v9518_v12 }
 0x222   :  { %8782 = vmatprep.subr.bf16.mxu1 %v9522_v19  ;;  %6889 = vmatmul.mubr.bf16.vlgmr.msra.gmra.mrb[64].mxu0 %v550_v18  ;;  %v9559_v18 = vld [vmem:[%s11762_s1 + $0x12c8] sm:$0xff]  }
 0x223   :  { %8761 = vmatpush3.bf16.msra.mxu0 %v9521_v17  ;;  %6968 = vmatprep.mubr.bf16.mxu0 %v555_v11  ;;  %v9558_v17 = vld [vmem:[%s11762_s1 + $0x1208] sm:$0xff]   ;;  %v9593_v11 = vld [vmem:[%s11762_s1 + $0x1318] sm:$0xff]  }
 0x224   :  { %6929 = vmatmul.mubr.bf16.vlgmr.msra.gmra.mrb[64].mxu1 %v552_v23  ;;  %8762 = vmatprep.subr.bf16.mxu0 %v9524_v24  ;;  %v9560_v19 = vld [vmem:[%s11762_s1 + $0x1288] sm:$0xff]   ;;  %v9564_v23 = vld [vmem:[%s11762_s1 + $0x1290] sm:$0xff]   ;;  %v9565_v24 = vld [vmem:[%s11762_s1 + $0x1258] sm:$0xff]  }
 0x225   :  { %8783 = vmatpush3.bf16.msra.mxu1 %v9523_v22  ;;  %v9563_v22 = vld [vmem:[%s11762_s1 + $0x12d0] sm:$0xff]  }
 0x226   :  { %8784 = vmatprep.subr.bf16.mxu1 %v9526_v27  ;;  %v9568_v27 = vld [vmem:[%s11762_s1 + $0x1298] sm:$0xff]  }
 0x227   :  { %8763 = vmatpush3.bf16.msra.mxu0 %v9525_v26  ;;  %v9567_v26 = vld [vmem:[%s11762_s1 + $0x12d8] sm:$0xff]  }
 0x228   :  { %8764 = vmatprep.subr.bf16.mxu0 %v9528_v29  ;;  %v9570_v29 = vld [vmem:[%s11762_s1 + $0x1220] sm:$0xff]  }
 0x229   :  { %8785 = vmatpush3.bf16.msra.mxu1 %v9527_v28  ;;  %v9569_v28 = vld [vmem:[%s11762_s1 + $0x1260] sm:$0xff]  }
 0x22a   :  { %8786 = vmatprep.subr.bf16.mxu1 %v9530_v31  ;;  %v9572_v31 = vld [vmem:[%s11762_s1 + $0x12a0] sm:$0xff]  }
 0x22b   :  { %8765 = vmatpush3.bf16.msra.mxu0 %v9529_v30  ;;  %v9571_v30 = vld [vmem:[%s11762_s1 + $0x12e0] sm:$0xff]  }
 0x22c   :  { %8766 = vmatprep.subr.bf16.mxu0 %v9532_v33  ;;  %v9574_v33 = vld [vmem:[%s11762_s1 + $0x1228] sm:$0xff]  }
 0x22d   :  { %8787 = vmatpush3.bf16.msra.mxu1 %v9531_v32  ;;  %v9573_v32 = vld [vmem:[%s11762_s1 + $0x1268] sm:$0xff]  }
 0x22e   :  { %8788 = vmatprep.subr.bf16.mxu1 %v9534_v35  ;;  %v9575_v35 = vld [vmem:[%s11762_s1 + $0x12e8] sm:$0xff]  }
 0x22f   :  { %8767 = vmatpush3.bf16.msra.mxu0 %v9533_v34 }
 0x230   :  { %8768 = vmatprep.subr.bf16.mxu0 %v9536_v37 }
 0x231   :  { %8789 = vmatpush3.bf16.msra.mxu1 %v9535_v36 }
 0x232   :  { %8790 = vmatprep.subr.bf16.mxu1 %v9538_v39 }
 0x233   :  { %8769 = vmatpush3.bf16.msra.mxu0 %v9537_v38 }
 0x234   :  { %8770 = vmatprep.subr.bf16.mxu0 %v9540_v42  ;;  %v9576_v42 = vld [vmem:[%s11762_s1 + $0x12a8] sm:$0xff]  }
 0x235   :  { %v8468_v44 = vpop.f32.mrb[40].mxu0  ;;  %8791 = vmatpush3.bf16.msra.mxu1 %v9539_v40 }
 0x236   :  { %v8469_v46 = vpop.f32.mrb[41].mxu0  ;;  %8792 = vmatprep.subr.bf16.mxu1 %v9542_v45 }
 0x237   :  { %v8490_v47 = vpop.f32.mrb[40].mxu1  ;;  %v8470_v50 = vadd.f32 %v8469_v46, %v8468_v44  ;;  %v8471_v51 = vpop.f32.mrb[42].mxu0  ;;  %8771 = vmatpush3.bf16.msra.mxu0 %v9541_v43  ;;  %v9577_v43 = vld [vmem:[%s11762_s1 + $0x1270] sm:$0xff]  }
 0x238   :  { %v8491_v52 = vpop.f32.mrb[41].mxu1  ;;  %v8472_v53 = vpop.f32.mrb[43].mxu0  ;;  %8772 = vmatprep.subr.bf16.mxu0 %v9544_v49  ;;  %v9578_v46 = vld [vmem:[%s11762_s1 + $0x1230] sm:$0xff]  }
 0x239   :  { %v8492_v54 = vadd.f32 %v8491_v52, %v8490_v47  ;;  %v6411_v56 = vadd.f32 %v8470_v50, %v11409_v7  ;;  %v8493_v58 = vpop.f32.mrb[42].mxu1  ;;  %8793 = vmatpush3.bf16.msra.mxu1 %v9543_v48  ;;  %v371_v7 = vrot.slane %v357_v4, %v9779_v41  ;;  %v9579_v48 = vld [vmem:[%s11762_s1 + $0x12f0] sm:$0xff]   ;;  %v9581_v53 = vld [vmem:[%s11762_s1 + $0x1278] sm:$0xff]   ;;  %v9588_v4 = vld [vmem:[%s11762_s1 + $0x1348] sm:$0xff]  }
 0x23a   :  { %v8494_v60 = vpop.f32.mrb[43].mxu1  ;;  %8794 = vmatprep.subr.bf16.mxu1 %v9546_v57  ;;  %v9580_v51 = vld [vmem:[%s11762_s1 + $0x12b0] sm:$0xff]   ;;  %v9584_v58 = vld [vmem:[%s11762_s1 + $0x12b8] sm:$0xff]  }
 0x23b   :  { %v11510_v61 = vadd.f32 %v8492_v54, %v6411_v56  ;;  %8773 = vmatpush3.bf16.msra.mxu0 %v9545_v55  ;;  %v373_v12 = vcombine.high %v371_v7, %v371_v7  ;;  %v556_v14 = vpack.c.bf16 %v371_v7, %v371_v7  ;;  %v9582_v54 = vld [vmem:[%s11762_s1 + $0x1238] sm:$0xff]   ;;  %v46_v56 = vld [vmem:[%s11761_s0 + $0x90] sm:$0xff]  ;;  %v9585_v60 = vld [vmem:[%s11762_s1 + $0x1340] sm:$0xff]  }
 0x23c   :  { %8774 = vmatprep.subr.bf16.mxu0 %v9548_v62  ;;  %v9583_v55 = vld [vmem:[%s11762_s1 + $0x12f8] sm:$0xff]   ;;  %v381_v57 = vrot.slane %v46_v56, %v9779_v41  ;;  %v9589_v7 = vld [vmem:[%s11762_s1 + $0x1308] sm:$0xff]  }
 0x23d   :  { %8795 = vmatpush3.bf16.msra.mxu1 %v9547_v59  ;;  %v557_v16 = vpack.c.bf16 %v373_v12, %v373_v12  ;;  %v374_v59 = vcombine.high %v46_v56, %v46_v56  ;;  %v9594_v12 = vld [vmem:[%s11762_s1 + $0x1360] sm:$0xff]  }
 0x23e   :  { %8796 = vmatprep.subr.bf16.mxu1 %v9550_v0 }
 0x23f   :  { %8775 = vmatpush3.bf16.msra.mxu0 %v9549_v63  ;;  %7008 = vmatprep.mubr.bf16.mxu1 %v557_v16  ;;  %v388_v62 = vrot.slane %v374_v59, %v9779_v41  ;;  %v558_v63 = vpack.c.bf16 %v381_v57, %v381_v57 }
 0x240   :  { %8804 = vmatprep.subr.bf16.mxu0 %v9552_v5 }
 0x241   :  { %8797 = vmatpush3.bf16.msra.mxu1 %v9551_v3  ;;  %v390_v1 = vcombine.high %v388_v62, %v388_v62  ;;  %v560_v3 = vpack.c.bf16 %v388_v62, %v388_v62 }
 0x242   :  { %6969 = vmatmul.mubr.bf16.vlgmr.msra.gmra.mrb[68].mxu0 %v554_v9  ;;  %8826 = vmatprep.subr.bf16.mxu1 %v9555_v10  ;;  %v9591_v9 = vld [vmem:[%s11762_s1 + $0x1310] sm:$0xff]   ;;  %v9592_v10 = vld [vmem:[%s11762_s1 + $0x1358] sm:$0xff]  }
 0x243   :  { %8805 = vmatpush3.bf16.msra.mxu0 %v9554_v8  ;;  %v561_v5 = vpack.c.bf16 %v390_v1, %v390_v1  ;;  %v9590_v8 = vld [vmem:[%s11762_s1 + $0x1350] sm:$0xff]  }
 0x244   :  { %7009 = vmatmul.mubr.bf16.vlgmr.msra.gmra.mrb[68].mxu1 %v556_v14  ;;  %8806 = vmatprep.subr.bf16.mxu0 %v9557_v15  ;;  %v47_v14 = vld [vmem:[%s11761_s0 + $0x98] sm:$0x3f] }
 0x245   :  { %8827 = vmatpush3.bf16.msra.mxu1 %v9556_v13  ;;  %7088 = vmatprep.mubr.bf16.mxu1 %v561_v5  ;;  %v9602_v13 = vld [vmem:[%s11762_s1 + $0x1380] sm:$0xff]   ;;  %v391_v15 = vcombine.high %v47_v14, %v47_v14  ;;  %v398_v16 = vrot.slane %v47_v14, %v9779_v41 }
 0x246   :  { %8828 = vmatprep.subr.bf16.mxu1 %v9559_v18 }
 0x247   :  { %8807 = vmatpush3.bf16.msra.mxu0 %v9558_v17 }
 0x248   :  { %8808 = vmatprep.subr.bf16.mxu0 %v9561_v20 }
 0x249   :  { %8829 = vmatpush3.bf16.msra.mxu1 %v9560_v19 }
 0x24a   :  { %8830 = vmatprep.subr.bf16.mxu1 %v9563_v22 }
 0x24b   :  { %8809 = vmatpush3.bf16.msra.mxu0 %v9562_v21 }
 0x24c   :  { %8810 = vmatprep.subr.bf16.mxu0 %v9565_v24 }
 0x24d   :  { %8831 = vmatpush3.bf16.msra.mxu1 %v9564_v23 }
 0x24e   :  { %8832 = vmatprep.subr.bf16.mxu1 %v9567_v26 }
 0x24f   :  { %8811 = vmatpush3.bf16.msra.mxu0 %v9566_v25 }
 0x250   :  { %8812 = vmatprep.subr.bf16.mxu0 %v9569_v28 }
 0x251   :  { %8833 = vmatpush3.bf16.msra.mxu1 %v9568_v27 }
 0x252   :  { %8834 = vmatprep.subr.bf16.mxu1 %v9571_v30 }
 0x253   :  { %8813 = vmatpush3.bf16.msra.mxu0 %v9570_v29 }
 0x254   :  { %8814 = vmatprep.subr.bf16.mxu0 %v9573_v32 }
 0x255   :  { %v8512_v34 = vpop.f32.mrb[44].mxu0  ;;  %8835 = vmatpush3.bf16.msra.mxu1 %v9572_v31 }
 0x256   :  { %v8513_v36 = vpop.f32.mrb[45].mxu0  ;;  %8836 = vmatprep.subr.bf16.mxu1 %v9575_v35 }
 0x257   :  { %v8534_v37 = vpop.f32.mrb[44].mxu1  ;;  %v8514_v38 = vadd.f32 %v8513_v36, %v8512_v34  ;;  %v8515_v39 = vpop.f32.mrb[46].mxu0  ;;  %8815 = vmatpush3.bf16.msra.mxu0 %v9574_v33 }
 0x258   :  { %v8535_v40 = vpop.f32.mrb[45].mxu1  ;;  %v8516_v44 = vpop.f32.mrb[47].mxu0  ;;  %8816 = vmatprep.subr.bf16.mxu0 %v9577_v43 }
 0x259   :  { %v8536_v45 = vadd.f32 %v8535_v40, %v8534_v37  ;;  %v6491_v47 = vadd.f32 %v8514_v38, %v11510_v61  ;;  %v8537_v49 = vpop.f32.mrb[46].mxu1  ;;  %8837 = vmatpush3.bf16.msra.mxu1 %v9576_v42  ;;  %v389_v61 = vcombine.high %v381_v57, %v381_v57 }
 0x25a   :  { %v8538_v52 = vpop.f32.mrb[47].mxu1  ;;  %8838 = vmatprep.subr.bf16.mxu1 %v9579_v48 }
 0x25b   :  { %v11611_v50 = vadd.f32 %v8536_v45, %v6491_v47  ;;  %8817 = vmatpush3.bf16.msra.mxu0 %v9578_v46  ;;  %v559_v0 = vpack.c.bf16 %v389_v61, %v389_v61 }
 0x25c   :  { %8818 = vmatprep.subr.bf16.mxu0 %v9581_v53 }
 0x25d   :  { %8839 = vmatpush3.bf16.msra.mxu1 %v9580_v51  ;;  %7048 = vmatprep.mubr.bf16.mxu0 %v559_v0 }
 0x25e   :  { %8840 = vmatprep.subr.bf16.mxu1 %v9583_v55 }
 0x25f   :  { %8819 = vmatpush3.bf16.msra.mxu0 %v9582_v54 }
 0x260   :  { %8848 = vmatprep.subr.bf16.mxu0 %v9585_v60 }
 0x261   :  { %8841 = vmatpush3.bf16.msra.mxu1 %v9584_v58 }
 0x262   :  { %8889 = vmatprep.subr.bf16.mxu1 %v9629_v6  ;;  %7049 = vmatmul.mubr.bf16.vlgmr.msra.gmra.mrb[72].mxu0 %v558_v63 }
 0x263   :  { %8849 = vmatpush3.bf16.msra.mxu0 %v9587_v2 }
 0x264   :  { %7089 = vmatmul.mubr.bf16.vlgmr.msra.gmra.mrb[72].mxu1 %v560_v3  ;;  %8850 = vmatprep.subr.bf16.mxu0 %v9588_v4 }
 0x265   :  { %8891 = vmatprep.mubr.msk.bf16.mxu1 %vm9630_vm0, %v9629_v6 }
 0x267   :  { %8851 = vmatpush3.bf16.msra.mxu0 %v9589_v7 }
 0x268   :  { %8852 = vmatprep.subr.bf16.mxu0 %v9590_v8 }
 0x26b   :  { %8853 = vmatpush3.bf16.msra.mxu0 %v9591_v9 }
 0x26c   :  { %8854 = vmatprep.subr.bf16.mxu0 %v9592_v10 }
 0x26d   :  { %12 = vsyncpa [#allocation3], 0  ;;  %8890 = vmatpush3.bf16.msra.mxu1 %v9602_v13  ;;  %v9595_v17 = vld [vmem:[%s11762_s1 + $0x1320] sm:$0xff]   ;;  %v405_v18 = vrot.slane %v391_v15, %v9779_v41  ;;  %v406_v19 = vcombine.high %v398_v16, %v398_v16  ;;  %v9596_v20 = vld [vmem:[%s11762_s1 + $0x1368] sm:$0xff]   ;;  %vm5572_vm1 = vcmask 130048   ;;  %v562_v39 = vpack.c.bf16 %v398_v16, %v398_v16 }
 0x26e   :  { %v9597_v28 = vld [vmem:[%s11762_s1 + $0x1328] sm:$0xff]   ;;  %v9598_v30 = vld [vmem:[%s11762_s1 + $0x1370] sm:$0xff]   ;;  %v9600_v37 = vld [vmem:[%s11762_s1 + $0x1378] sm:$0xff]   ;;  %v9631_v4 = vmov 0.0|0.0   ;;  %vm7201_vm2 = vcmask 1043456   ;;  %vm7197_vm3 = vcmask 818176  }
 0x26f   :  { %8855 = vmatpush3.bf16.msra.mxu0 %v9593_v11  ;;  %v563_v22 = vpack.c.bf16 %v406_v19, %v406_v19  ;;  %v564_v23 = vpack.c.bf16 %v405_v18, %v405_v18  ;;  %v9599_v36 = vld [vmem:[%s11762_s1 + $0x1330] sm:$0xff]   ;;  %v9601_v38 = vld [vmem:[%s11762_s1 + $0x1338] sm:$0xff]   ;;  %v7177_v1 = vld [vmem:[%s11764_s3] sm:$0xff]  ;;  %8931 = vmatprep.subr.bf16.mxu1 %v9631_v4  ;;  %vm7289_vm4 = vcmask 1041408   ;;  %vm9632_vm5 = vmmov 1  }
 0x270   :  { %8856 = vmatprep.subr.bf16.mxu0 %v9594_v12  ;;  %v7178_v2 = vld [vmem:[%s11764_s3 + $0x8] sm:$0xff]  ;;  %v7179_v3 = vld [vmem:[%s11764_s3 + $0x10] sm:$0xff]  ;;  %v7180_v7 = vld [vmem:[%s11764_s3 + $0x18] sm:$0xff]  ;;  %vm7285_vm7 = vcmask 80896   ;;  %vm7363_vm8 = vcmask 9216  }
 0x271   :  { %7128 = vmatprep.mubr.bf16.mxu0 %v563_v22  ;;  %8892 = vmatmul.mubr.msk.bf16.vlgmr.msra.gmra.mrb[76].mxu1 %vm5572_vm1, %v564_v23  ;;  %v8932_v5 = vpack.c.bf16 %v7178_v2, %v7177_v1  ;;  %v8935_v8 = vpack.c.bf16 %v7180_v7, %v7179_v3  ;;  %v7181_v9 = vld [vmem:[%s11764_s3 + $0x20] sm:$0xff]  ;;  %v7182_v10 = vld [vmem:[%s11764_s3 + $0x28] sm:$0xff]  ;;  %v7183_v12 = vld [vmem:[%s11764_s3 + $0x30] sm:$0xff] }
 0x272   :  { %8921 = vmatprep.mubr.msk.f32.mxu1 %vm9630_vm0, %v9629_v6  ;;  %v8938_v11 = vpack.c.bf16 %v7182_v10, %v7181_v9  ;;  %v7184_v13 = vld [vmem:[%s11764_s3 + $0x38] sm:$0xff]  ;;  %v7185_v16 = vld [vmem:[%s11764_s3 + $0x40] sm:$0xff]  ;;  %vm8951_vm6 = vmpackc.low %vm7289_vm4, %vm9632_vm5 }
 0x273   :  { %8857 = vmatpush3.bf16.msra.mxu0 %v9595_v17  ;;  %8933 = vmatpush3.bf16.msra.mxu1 %v8932_v5  ;;  %v8941_v14 = vpack.c.bf16 %v7184_v13, %v7183_v12  ;;  %v7186_v17 = vld [vmem:[%s11764_s3 + $0x48] sm:$0xff] }
 0x274   :  { %8858 = vmatprep.subr.bf16.mxu0 %v9596_v20  ;;  %8934 = vmatprep.subr.bf16.mxu1 %v9631_v4  ;;  %v8944_v19 = vpack.c.bf16 %v7186_v17, %v7185_v16 }
 0x275   :  { %v8556_v21 = vpop.f32.mrb[48].mxu0 }
 0x276   :  { %v8557_v24 = vpop.f32.mrb[49].mxu0 }
 0x277   :  { %v8558_v25 = vadd.f32 %v8557_v24, %v8556_v21  ;;  %v8559_v26 = vpop.f32.mrb[50].mxu0  ;;  %v8578_v27 = vpop.f32.mrb[48].mxu1  ;;  %8859 = vmatpush3.bf16.msra.mxu0 %v9597_v28  ;;  %8936 = vmatpush3.bf16.msra.mxu1 %v8935_v8  ;;  %v7187_v28 = vld [vmem:[%s11764_s3 + $0x50] sm:$0xff] }
 0x278   :  { %v8560_v41 = vpop.f32.mrb[51].mxu0  ;;  %v8579_v29 = vpop.f32.mrb[49].mxu1  ;;  %8860 = vmatprep.subr.bf16.mxu0 %v9598_v30  ;;  %8937 = vmatprep.subr.bf16.mxu1 %v9631_v4 }
 0x279   :  { %v6571_v31 = vadd.f32 %v8558_v25, %v11611_v50  ;;  %v8580_v32 = vadd.f32 %v8579_v29, %v8578_v27  ;;  %v8581_v33 = vpop.f32.mrb[50].mxu1  ;;  %v7188_v41 = vld [vmem:[%s11764_s3 + $0x58] sm:$0xff] }
 0x27a   :  { %v8582_v34 = vpop.f32.mrb[51].mxu1  ;;  %v8947_v30 = vpack.c.bf16 %v7188_v41, %v7187_v28 }
 0x27b   :  { %v6611_v35 = vadd.f32 %v8580_v32, %v6571_v31  ;;  %8861 = vmatpush3.bf16.msra.mxu0 %v9599_v36  ;;  %8939 = vmatpush3.bf16.msra.mxu1 %v8938_v11  ;;  %v7189_v32 = vld [vmem:[%s11764_s3 + $0x60] sm:$0xf] }
 0x27c   :  { %8862 = vmatprep.subr.bf16.mxu0 %v9600_v37  ;;  %8940 = vmatprep.subr.bf16.mxu1 %v9631_v4 }
 0x27f   :  { %8863 = vmatpush3.bf16.msra.mxu0 %v9601_v38  ;;  %8942 = vmatpush3.bf16.msra.mxu1 %v8941_v14 }
 0x280   :  { %8943 = vmatprep.subr.bf16.mxu1 %v9631_v4 }
 0x282   :  { %7129 = vmatmul.mubr.bf16.vlgmr.msra.gmra.mrb[76].mxu0 %v562_v39 }
 0x283   :  { %8945 = vmatpush3.bf16.msra.mxu1 %v8944_v19  ;;  %v7276_v19 = vld [vmem:[%s11766_s5] sm:$0xff] }
 0x284   :  { %8946 = vmatprep.subr.bf16.mxu1 %v9631_v4 }
 0x287   :  { %8948 = vmatpush3.bf16.msra.mxu1 %v8947_v30 }
 0x288   :  { %8919 = vmatprep.subr.mxu1 %v9629_v6 }
 0x28b   :  { %8920 = vmatpush3.msk.msra.mxu1 %vm7201_vm2, %v7189_v32 }
 0x28c   :  { %8949 = vmatprep.subr.bf16.mxu1 %v9631_v4 }
 0x295   :  { %v8600_v40 = vpop.f32.mrb[52].mxu0 }
 0x296   :  { %v8601_v42 = vpop.f32.mrb[53].mxu0 }
 0x297   :  { %v8602_v43 = vadd.f32 %v8601_v42, %v8600_v40  ;;  %v8603_v44 = vpop.f32.mrb[54].mxu0  ;;  %v8622_v45 = vpop.f32.mrb[52].mxu1 }
 0x298   :  { %v8604_v46 = vpop.f32.mrb[55].mxu0  ;;  %v8623_v47 = vpop.f32.mrb[53].mxu1 }
 0x299   :  { %v6651_v48 = vadd.f32 %v8602_v43, %v6611_v35  ;;  %v8624_v49 = vadd.f32 %v8623_v47, %v8622_v45  ;;  %v8625_v50 = vpop.f32.mrb[54].mxu1 }
 0x29a   :  { %v8626_v51 = vpop.f32.mrb[55].mxu1 }
 0x29b   :  { %v6691_v52 = vadd.f32 %v8624_v49, %v6651_v48 }
 0x2b5   :  { %v8644_v53 = vpop.f32.mrb[56].mxu0 }
 0x2b6   :  { %v8645_v54 = vpop.f32.mrb[57].mxu0 }
 0x2b7   :  { %v8646_v55 = vadd.f32 %v8645_v54, %v8644_v53  ;;  %v8647_v56 = vpop.f32.mrb[58].mxu0  ;;  %v8666_v57 = vpop.f32.mrb[56].mxu1 }
 0x2b8   :  { %v8648_v58 = vpop.f32.mrb[59].mxu0  ;;  %v8667_v59 = vpop.f32.mrb[57].mxu1 }
 0x2b9   :  { %v6731_v60 = vadd.f32 %v8646_v55, %v6691_v52  ;;  %v8668_v61 = vadd.f32 %v8667_v59, %v8666_v57  ;;  %v8669_v62 = vpop.f32.mrb[58].mxu1 }
 0x2ba   :  { %v8670_v63 = vpop.f32.mrb[59].mxu1 }
 0x2bb   :  { %v6771_v0 = vadd.f32 %v8668_v61, %v6731_v60 }
 0x2d5   :  { %v8688_v15 = vpop.f32.mrb[60].mxu0 }
 0x2d6   :  { %v8689_v18 = vpop.f32.mrb[61].mxu0 }
 0x2d7   :  { %v8690_v20 = vadd.f32 %v8689_v18, %v8688_v15  ;;  %v8691_v21 = vpop.f32.mrb[62].mxu0  ;;  %v8710_v22 = vpop.f32.mrb[60].mxu1 }
 0x2d8   :  { %v8692_v23 = vpop.f32.mrb[63].mxu0  ;;  %v8711_v24 = vpop.f32.mrb[61].mxu1 }
 0x2d9   :  { %v6811_v25 = vadd.f32 %v8690_v20, %v6771_v0  ;;  %v8712_v26 = vadd.f32 %v8711_v24, %v8710_v22  ;;  %v8713_v27 = vpop.f32.mrb[62].mxu1  ;;  %v7277_v20 = vld [vmem:[%s11766_s5 + $0x8] sm:$0x3]  ;;  %v8006_v22 = vld [vmem:[%s11765_s4] ss:$0 sm:$0xff]  ;;  %s9633_s5 = smov [#allocation2]  }
 0x2da   :  { %v8714_v29 = vpop.f32.mrb[63].mxu1  ;;  %v8950_v21 = vpack.c.bf16 %v7277_v20, %v7276_v19  ;;  %s7371_s23 = sshll.u32 %s9633_s5, 4  ;;  %s7372_s23 = int_to_ptr.vmem [resolvable:$true] %s7371_s23 }
 0x2db   :  { %v6851_v31 = vadd.f32 %v8712_v26, %v6811_v25  ;;  %v8009_v26 = vld [vmem:[%s11767_s6] ss:$0 sm:$0xff]  ;;  %s9604_s24 = scalar_lea.vmem %s7372_s23, 32  ;;  %p9609_p1 = scmp.lt.s32.totalorder %s7372_s23, %s7372_s23 }
 0x2dc   :  { %p9605_p0 = scmp.ne.s32.totalorder %s7372_s23, %s9604_s24  ;;  %p9610_p2 = scmp.lt.s32.totalorder %s9604_s24, %s9604_s24 }
 0x2de   :  { %p9611_p3 = por %p9610_p2, %p9609_p1 }
 0x2e0   :  { %p9612_p4 = pnand %p9611_p3, %p9605_p0 }
 0x2f5   :  { %v8732_v33 = vpop.f32.mrb[64].mxu0 }
 0x2f6   :  { %v8733_v34 = vpop.f32.mrb[65].mxu0 }
 0x2f7   :  { %v8734_v35 = vadd.f32 %v8733_v34, %v8732_v33  ;;  %v8735_v36 = vpop.f32.mrb[66].mxu0  ;;  %v8754_v37 = vpop.f32.mrb[64].mxu1 }
 0x2f8   :  { %v8736_v38 = vpop.f32.mrb[67].mxu0  ;;  %v8755_v39 = vpop.f32.mrb[65].mxu1 }
 0x2f9   :  { %v6891_v40 = vadd.f32 %v8734_v35, %v6851_v31  ;;  %v8756_v42 = vadd.f32 %v8755_v39, %v8754_v37  ;;  %v8757_v43 = vpop.f32.mrb[66].mxu1 }
 0x2fa   :  { %v8758_v44 = vpop.f32.mrb[67].mxu1 }
 0x2fb   :  { %v6931_v45 = vadd.f32 %v8756_v42, %v6891_v40 }
 0x315   :  { %v8776_v46 = vpop.f32.mrb[68].mxu0 }
 0x316   :  { %v8777_v47 = vpop.f32.mrb[69].mxu0 }
 0x317   :  { %v8778_v48 = vadd.f32 %v8777_v47, %v8776_v46  ;;  %v8779_v49 = vpop.f32.mrb[70].mxu0  ;;  %v8798_v50 = vpop.f32.mrb[68].mxu1 }
 0x318   :  { %v8780_v51 = vpop.f32.mrb[71].mxu0  ;;  %v8799_v52 = vpop.f32.mrb[69].mxu1 }
 0x319   :  { %v6971_v53 = vadd.f32 %v8778_v48, %v6931_v45  ;;  %v8800_v54 = vadd.f32 %v8799_v52, %v8798_v50  ;;  %v8801_v55 = vpop.f32.mrb[70].mxu1 }
 0x31a   :  { %v8802_v56 = vpop.f32.mrb[71].mxu1 }
 0x31b   :  { %v7011_v57 = vadd.f32 %v8800_v54, %v6971_v53 }
 0x335   :  { %v8820_v58 = vpop.f32.mrb[72].mxu0 }
 0x336   :  { %v8821_v59 = vpop.f32.mrb[73].mxu0 }
 0x337   :  { %v8822_v60 = vadd.f32 %v8821_v59, %v8820_v58  ;;  %v8823_v61 = vpop.f32.mrb[74].mxu0  ;;  %v8842_v62 = vpop.f32.mrb[72].mxu1 }
 0x338   :  { %v8824_v63 = vpop.f32.mrb[75].mxu0  ;;  %v8843_v0 = vpop.f32.mrb[73].mxu1 }
 0x339   :  { %v7051_v1 = vadd.f32 %v8822_v60, %v7011_v57  ;;  %v8844_v2 = vadd.f32 %v8843_v0, %v8842_v62  ;;  %v8845_v3 = vpop.f32.mrb[74].mxu1 }
 0x33a   :  { %v8846_v4 = vpop.f32.mrb[75].mxu1 }
 0x33b   :  { %v7091_v5 = vadd.f32 %v8844_v2, %v7051_v1 }
 0x344   :  { %v7170_v7 = vpop.f32.mrb[76].mxu1 }
 0x345   :  { %v8893_v8 = vpop.f32.mrb[77].mxu1 }
 0x346   :  { %v7173_v9 = vpop.f32.mrb[78].mxu1 }
 0x347   :  { %v8894_v10 = vpop.f32.mrb[79].mxu1 }
 0x355   :  { %v8864_v11 = vpop.f32.mrb[76].mxu0 }
 0x356   :  { %v8865_v12 = vpop.f32.mrb[77].mxu0 }
 0x357   :  { %v8866_v13 = vadd.f32 %v8865_v12, %v8864_v11  ;;  %v8867_v14 = vpop.f32.mrb[78].mxu0 }
 0x358   :  { %v8868_v15 = vpop.f32.mrb[79].mxu0 }
 0x359   :  { %v7131_v16 = vadd.f32 %v8866_v13, %v7091_v5 }
 0x35b   :  { %v7171_v17 = vadd.f32 %v7170_v7, %v7131_v16 }
 0x35d   :  { %v7176_v18 = vmax.f32 %v7171_v17, 0.0 }
 0x35f   :  { %8922 = vmatmul.mubr.msk.f32.vlgmr.msra.gmra.mrb[80].mxu1 %vm7197_vm3, %v7176_v18 }
 0x360   :  { %8928 = vmatprep.mubr.msk.f32.mxu1 %vm9630_vm0, %v9629_v6  ;;  %8952 = vmatpush3.bf16.msk.msra.mxu1 %vm8951_vm6, %v8950_v21 }
 0x432   :  { %v7271_v23 = vpop.f32.mrb[80].mxu1 }
 0x433   :  { %v7272_v24 = vadd.f32 %v8006_v22, %v7271_v23  ;;  %v8923_v6 = vpop.f32.mrb[81].mxu1 }
 0x435   :  { %v7275_v25 = vmax.f32 %v7272_v24, 0.0 }
 0x437   :  { %8929 = vmatmul.mubr.msk.f32.vlgmr.msra.gmra.mrb[82].mxu1 %vm7285_vm7, %v7275_v25 }
 0x50a   :  { %v7359_v27 = vpop.f32.mrb[82].mxu1 }
 0x50b   :  { %v7360_v28 = vadd.f32 %v8009_v26, %v7359_v27  ;;  %v8930_v41 = vpop.f32.mrb[83].mxu1 }
 0x50d   :  { %7364 = vst.msk [vmem:[#allocation2] sm:$0x3] %vm7363_vm8, %v7360_v28 }
 0x50e   :  { %9615 = shalt.err (!%p9612_p4)
}
 0x50f   :  { %s9616_s26 = scalar_lea.hbm %s11768_s7, 32 }
 0x510   :  { %p9617_p5 = scmp.ne.s32.totalorder %s11768_s7, %s9616_s26  ;;  %p9620_p6 = scmp.lt.u32.totalorder %s9616_s26, %s11768_s7 }
 0x512   :  { %p9622_p7 = pnand %p9620_p6, %p9617_p5 }
 0x514   :  { %9625 = shalt.err (!%p9622_p7)
}
 0x515   :  { %7374 = dma.vmem_to_hbm [thread:$0]  %s7372_s23, 32, %s11768_s7, [#allocation3]  }
 0x516   :  { %9626 = dma.done.wait [#allocation3], 32  }
 0x517   :  { %9627 = vsyncadd [#allocation3], 4294967264 }
 0x518   :  { %7378 = vsyncpa [#allocation3], 1 }

</bundles_post_ra>
